<compile_context>
chip_gen: v7x
topology: tpu7x:2x2x1
jax: 0.10.0
libtpu: 0.0.40
codegen_flags: <defaults>
</compile_context>

<pallas_src>
import functools

import jax
import jax.numpy as jnp
from jax import lax
from jax.experimental import pallas as pl
from jax.experimental.pallas import tpu as pltpu


def _round_up(x, m):
    return (x + m - 1) // m * m


def _physical_vmem_bytes():
    try:
        info = pltpu.get_tpu_info()
        vm = getattr(info, "vmem_capacity_bytes", None)
        if vm:
            return int(vm)
    except Exception:
        pass
    return 128 * 2**20


def _aspp_kernel(x_ref, w_ref, bias_ref, out_ref, *,
                 out_h, out_w_p, kh_taps, kw_taps, dilation):
    """One grid step == (one image) x (one Cout tile).

    x_ref:    (1, Hp, Wp_p, Cin)       bf16  spatially zero-padded input
    w_ref:    (KH*KW, Cin, Tc)         bf16  conv weight with BN scale folded in
    bias_ref: (1, Tc)                  f32   fused BN bias
    out_ref:  (1, out_h*out_w_p, Tc)   lane-dense: Tc % 128 == 0, out_w_p % 16 == 0
    """
    cin = x_ref.shape[-1]
    tile_cout = out_ref.shape[-1]
    m = out_h * out_w_p

    acc = jnp.zeros((m, tile_cout), dtype=jnp.float32)
    for kw in range(kw_taps):
        # One (possibly sublane-misaligned) W shift per kw, materialized once.
        xw = x_ref[0, :, pl.ds(kw * dilation, out_w_p), :]       # (Hp, out_w_p, Cin)
        for kh in range(kh_taps):
            # Leading-dim shift of the already-shifted slab: no relayout.
            tap = xw[kh * dilation:kh * dilation + out_h]        # (out_h, out_w_p, Cin)
            tap = tap.reshape(m, cin)                            # view: out_w_p % 16 == 0
            acc = acc + jnp.dot(tap, w_ref[kh * kw_taps + kw],
                                preferred_element_type=jnp.float32)

    y = acc + bias_ref[...]                                      # fused eval-mode BN bias
    out_ref[0] = jnp.maximum(y, 0.0).astype(out_ref.dtype)       # ReLU


def aspp_forward(x, weight_oihw, bn_gamma, bn_beta, bn_mean, bn_var, *,
                 padding, dilation, eps=1e-5,
                 input_layout="NCHW", out_layout="NCHW",
                 out_dtype=jnp.float32, tile_cout=None):
    """Pallas implementation of _ASPPModule.forward (eval-mode BN).

    x: (N, Cin, H, W) if input_layout == "NCHW", else (N, H, W, Cin).
    weight_oihw: (Cout, Cin, KH, KW)  (PyTorch conv weight layout)
    """
    if input_layout == "NCHW":
        N, Cin, H, W = x.shape
        x_nhwc = jnp.transpose(x, (0, 2, 3, 1))
    elif input_layout == "NHWC":
        N, H, W, Cin = x.shape
        x_nhwc = x
    else:
        raise ValueError(input_layout)
    if x_nhwc.dtype != jnp.bfloat16:
        x_nhwc = x_nhwc.astype(jnp.bfloat16)

    Cout, _, KH, KW = weight_oihw.shape
    KK = KH * KW

    out_h = H + 2 * padding - dilation * (KH - 1)
    out_w = W + 2 * padding - dilation * (KW - 1)
    # Over-pad out_w to the bf16 sublane tile so the in-kernel row collapse is a
    # view and the output store is sublane/lane dense; extra columns discarded.
    out_w_p = _round_up(out_w, 16)
    extra_w = out_w_p - out_w
    M = out_h * out_w_p
    Hp = H + 2 * padding
    Wp_p = W + 2 * padding + extra_w

    Cout_p = _round_up(Cout, 128)                 # lane-dense output channels
    if tile_cout is None:
        tile_cout = min(Cout_p, 256)
    tile_cout = min(_round_up(tile_cout, 128), Cout_p)
    if Cout_p % tile_cout != 0:
        tile_cout = Cout_p                        # fall back to a single tile
    n_ct = Cout_p // tile_cout

    # ---- spatial zero-pad (plus the throwaway right columns), single pass ----
    x_pad = jnp.pad(
        x_nhwc, ((0, 0), (padding, padding), (padding, padding + extra_w), (0, 0)))

    # ---- fold eval-mode BN into the conv weight; fused bias stays f32 ----
    scale = bn_gamma.astype(jnp.float32) / jnp.sqrt(bn_var.astype(jnp.float32) + eps)
    bias = bn_beta.astype(jnp.float32) - bn_mean.astype(jnp.float32) * scale
    # (Cout, Cin, KH, KW) -> (KH, KW, Cin, Cout) -> (KH*KW, Cin, Cout_p) bf16
    w = jnp.transpose(weight_oihw.astype(jnp.float32), (2, 3, 1, 0))
    w = w.reshape(KK, Cin, Cout) * scale[None, None, :]
    w = jnp.pad(w.astype(jnp.bfloat16), ((0, 0), (0, 0), (0, Cout_p - Cout)))
    bias_p = jnp.pad(bias, (0, Cout_p - Cout)).reshape(1, Cout_p)

    kernel = functools.partial(
        _aspp_kernel, out_h=out_h, out_w_p=out_w_p,
        kh_taps=KH, kw_taps=KW, dilation=dilation)

    # ---- generation-aware VMEM budget from the actual per-step tiles ----
    out_itemsize = jnp.dtype(out_dtype).itemsize
    bytes_x = 2 * Hp * Wp_p * Cin * 2             # double-buffered bf16 input block
    bytes_w = 2 * KK * Cin * tile_cout * 2        # constant block (2 buffers, see TODO)
    bytes_b = 2 * tile_cout * 4
    bytes_out = 2 * M * tile_cout * out_itemsize  # double-buffered output block
    bytes_acc = M * tile_cout * 4                 # f32 accumulator
    bytes_xw = Hp * out_w_p * Cin * 2             # materialized kw-shifted slab
    bytes_tap = 2 * out_h * out_w_p * Cin * 2
    footprint = (bytes_x + bytes_w + bytes_b + bytes_out
                 + bytes_acc + bytes_xw + bytes_tap)
    phys = _physical_vmem_bytes()
    cap = int(phys * 0.85)                        # ~54 MiB on v7x, ~108 MiB on v5e/v6e
    vmem_limit = int(min(cap, max(2 * footprint, 32 * 2**20)))

    out = pl.pallas_call(
        kernel,
        out_shape=jax.ShapeDtypeStruct((N, M, Cout_p), out_dtype),
        grid_spec=pltpu.PrefetchScalarGridSpec(
            num_scalar_prefetch=0,
            # Cout innermost: the image block index is unchanged across it, so
            # the big input DMA is issued once per image.
            grid=(N, n_ct),
            in_specs=[
                pl.BlockSpec((1, Hp, Wp_p, Cin), lambda n, c: (n, 0, 0, 0)),
                pl.BlockSpec((KK, Cin, tile_cout), lambda n, c: (0, 0, c)),
                pl.BlockSpec((1, tile_cout), lambda n, c: (0, c)),
            ],
            out_specs=pl.BlockSpec((1, M, tile_cout), lambda n, c: (n, 0, c)),
        ),
        compiler_params=pltpu.CompilerParams(
            dimension_semantics=("parallel", "parallel"),  # megacore split on v7x
            vmem_limit_bytes=vmem_limit),
    )(x_pad, w, bias_p)

    # Slice off the padded channels / throwaway columns.
    out = out.reshape(N, out_h, out_w_p, Cout_p)[:, :, :out_w, :Cout]
    if out_layout == "NCHW":
        out = jnp.transpose(out, (0, 3, 1, 2))
    elif out_layout != "NHWC":
        raise ValueError(out_layout)
    return out


def reference_forward(x_nchw, weight_oihw, bn_gamma, bn_beta, bn_mean, bn_var,
                      *, padding, dilation, eps=1e-5, quantize=False):
    """Pure-JAX reference.  quantize=True emulates the kernel's bf16 operands."""
    scale = bn_gamma / jnp.sqrt(bn_var + eps)
    bias = bn_beta - bn_mean * scale
    x = x_nchw.astype(jnp.float32)
    w = weight_oihw.astype(jnp.float32) * scale[:, None, None, None]
    if quantize:
        x = x.astype(jnp.bfloat16).astype(jnp.float32)
        w = w.astype(jnp.bfloat16).astype(jnp.float32)
    y = lax.conv_general_dilated(
        x, w, window_strides=(1, 1),
        padding=((padding, padding), (padding, padding)),
        rhs_dilation=(dilation, dilation),
        dimension_numbers=("NCHW", "OIHW", "NCHW"))
    return jnp.maximum(y + bias.reshape(1, -1, 1, 1), 0.0)


if __name__ == "__main__":
    N, Cin, Cout = 2, 4, 8
    key = jax.random.PRNGKey(0)
    kx16, kx13, kw3, kw1, km, kv = jax.random.split(key, 6)

    # BN params per _init_weight (gamma=1, beta=0); non-trivial running stats to
    # exercise the fused eval-mode scale/bias path.
    bn_gamma = jnp.ones((Cout,), jnp.float32)
    bn_beta = jnp.zeros((Cout,), jnp.float32)
    bn_mean = 0.1 * jax.random.normal(km, (Cout,), jnp.float32)
    bn_var = jax.random.uniform(kv, (Cout,), jnp.float32, minval=0.5, maxval=1.5)

    # (kernel_size, padding, dilation, weight_key) -- dilated 3x3 and 1x1 branches
    configs = [(3, 2, 2, kw3), (1, 0, 1, kw1)]
    inputs = [
        jax.random.normal(kx16, (N, Cin, 16, 16), dtype=jnp.float32),  # aligned out_w
        jax.random.normal(kx13, (N, Cin, 13, 13), dtype=jnp.float32),  # odd -> over-pad path
    ]

    for x in inputs:
        H, W = x.shape[2], x.shape[3]
        for ks, padding, dilation, wkey in configs:
            fan_in = Cin * ks * ks
            weight = jax.random.normal(wkey, (Cout, Cin, ks, ks), jnp.float32) \
                * jnp.sqrt(2.0 / fan_in)        # kaiming_normal_ (fan_in, relu)

            run = jax.jit(functools.partial(
                aspp_forward, padding=padding, dilation=dilation))
            out = jax.block_until_ready(
                run(x, weight, bn_gamma, bn_beta, bn_mean, bn_var))
            out_h = H + 2 * padding - dilation * (ks - 1)
            out_w = W + 2 * padding - dilation * (ks - 1)
            assert out.shape == (N, Cout, out_h, out_w), out.shape

            # Tight check vs. a reference using the same bf16 operand rounding.
            ref_q = reference_forward(x, weight, bn_gamma, bn_beta, bn_mean, bn_var,
                                      padding=padding, dilation=dilation, quantize=True)
            err_q = float(jnp.max(jnp.abs(out - ref_q)))
            assert jnp.allclose(out, ref_q, atol=2e-3, rtol=2e-3), err_q

            # Loose sanity check vs. full precision (bf16 operand noise).
            ref_f = reference_forward(x, weight, bn_gamma, bn_beta, bn_mean, bn_var,
                                      padding=padding, dilation=dilation, quantize=False)
            err_f = float(jnp.max(jnp.abs(out - ref_f)))
            assert jnp.allclose(out, ref_f, atol=1e-1, rtol=1e-1), err_f

    # bf16-output + NHWC-in/out fast path (what the ASPP concat consumer wants).
    x = inputs[0]
    ks, padding, dilation, wkey = configs[0]
    weight = jax.random.normal(wkey, (Cout, Cin, ks, ks), jnp.float32) \
        * jnp.sqrt(2.0 / (Cin * ks * ks))
    x_nhwc = jnp.transpose(x, (0, 2, 3, 1)).astype(jnp.bfloat16)
    run_fast = jax.jit(functools.partial(
        aspp_forward, padding=padding, dilation=dilation,
        input_layout="NHWC", out_layout="NHWC", out_dtype=jnp.bfloat16))
    out_fast = jax.block_until_ready(
        run_fast(x_nhwc, weight, bn_gamma, bn_beta, bn_mean, bn_var))
    ref_q = reference_forward(x, weight, bn_gamma, bn_beta, bn_mean, bn_var,
                              padding=padding, dilation=dilation, quantize=True)
    ref_nhwc = jnp.transpose(ref_q, (0, 2, 3, 1))
    err = float(jnp.max(jnp.abs(out_fast.astype(jnp.float32) - ref_nhwc)))
    assert err < 6e-2, err

    print("KERNEL_OK")
</pallas_src>

<mosaic_0001>
module attributes {stable_mosaic.version = 11 : i64} {
  func.func @_aspp_kernel(%arg0: i32, %arg1: i32, %arg2: memref<1x20x20x4xbf16, #tpu.memory_space<vmem>>, %arg3: memref<9x4x128xbf16, #tpu.memory_space<vmem>>, %arg4: memref<1x128xf32, #tpu.memory_space<vmem>>, %arg5: memref<1x256x128xf32, #tpu.memory_space<vmem>>) attributes {dimension_semantics = [#tpu.dimension_semantics<parallel>, #tpu.dimension_semantics<parallel>], iteration_bounds = array<i64: 2, 1>, scalar_prefetch = 0 : i64, scratch_operands = 0 : i64, tpu.core_type = #tpu.core_type<tc>, window_params = [{transform_indices = @transform_0, window_bounds = array<i64: 1, 20, 20, 4>}, {transform_indices = @transform_1, window_bounds = array<i64: 9, 4, 128>}, {transform_indices = @transform_2, window_bounds = array<i64: 1, 128>}, {transform_indices = @transform_3, window_bounds = array<i64: 1, 256, 128>}]} {
    %cst = arith.constant 0.000000e+00 : f32
    %0 = vector.broadcast %cst : f32 to vector<256x128xf32>
    %c0 = arith.constant 0 : index
    %c0_0 = arith.constant 0 : index
    %c0_1 = arith.constant 0 : index
    %c0_2 = arith.constant 0 : index
    %1 = vector.load %arg2[%c0, %c0_0, %c0_1, %c0_2] : memref<1x20x20x4xbf16, #tpu.memory_space<vmem>>, vector<1x20x16x4xbf16>
    %2 = vector.shape_cast %1 : vector<1x20x16x4xbf16> to vector<20x16x4xbf16>
    %3 = vector.extract_strided_slice %2 {offsets = [0, 0, 0], sizes = [16, 16, 4], strides = [1, 1, 1]} : vector<20x16x4xbf16> to vector<16x16x4xbf16>
    %4 = vector.shape_cast %3 : vector<16x16x4xbf16> to vector<256x4xbf16>
    %c0_3 = arith.constant 0 : index
    %c0_4 = arith.constant 0 : index
    %c0_5 = arith.constant 0 : index
    %5 = vector.load %arg3[%c0_3, %c0_4, %c0_5] : memref<9x4x128xbf16, #tpu.memory_space<vmem>>, vector<1x4x128xbf16>
    %6 = vector.shape_cast %5 : vector<1x4x128xbf16> to vector<4x128xbf16>
    %cst_6 = arith.constant dense<0.000000e+00> : vector<256x128xf32>
    %7 = tpu.matmul %4, %6, %cst_6 {dimension_numbers = #tpu.dot_dimension_numbers<[1], [0], [0], [1], [0, 0, 1, 1], [], []>} : vector<256x4xbf16>, vector<4x128xbf16>, vector<256x128xf32> -> vector<256x128xf32>
    %8 = arith.addf %0, %7 : vector<256x128xf32>
    %9 = vector.extract_strided_slice %2 {offsets = [2, 0, 0], sizes = [16, 16, 4], strides = [1, 1, 1]} : vector<20x16x4xbf16> to vector<16x16x4xbf16>
    %10 = vector.shape_cast %9 : vector<16x16x4xbf16> to vector<256x4xbf16>
    %c3 = arith.constant 3 : index
    %c0_7 = arith.constant 0 : index
    %c0_8 = arith.constant 0 : index
    %11 = vector.load %arg3[%c3, %c0_7, %c0_8] : memref<9x4x128xbf16, #tpu.memory_space<vmem>>, vector<1x4x128xbf16>
    %12 = vector.shape_cast %11 : vector<1x4x128xbf16> to vector<4x128xbf16>
    %cst_9 = arith.constant dense<0.000000e+00> : vector<256x128xf32>
    %13 = tpu.matmul %10, %12, %cst_9 {dimension_numbers = #tpu.dot_dimension_numbers<[1], [0], [0], [1], [0, 0, 1, 1], [], []>} : vector<256x4xbf16>, vector<4x128xbf16>, vector<256x128xf32> -> vector<256x128xf32>
    %14 = arith.addf %8, %13 : vector<256x128xf32>
    %15 = vector.extract_strided_slice %2 {offsets = [4, 0, 0], sizes = [16, 16, 4], strides = [1, 1, 1]} : vector<20x16x4xbf16> to vector<16x16x4xbf16>
    %16 = vector.shape_cast %15 : vector<16x16x4xbf16> to vector<256x4xbf16>
    %c6 = arith.constant 6 : index
    %c0_10 = arith.constant 0 : index
    %c0_11 = arith.constant 0 : index
    %17 = vector.load %arg3[%c6, %c0_10, %c0_11] : memref<9x4x128xbf16, #tpu.memory_space<vmem>>, vector<1x4x128xbf16>
    %18 = vector.shape_cast %17 : vector<1x4x128xbf16> to vector<4x128xbf16>
    %cst_12 = arith.constant dense<0.000000e+00> : vector<256x128xf32>
    %19 = tpu.matmul %16, %18, %cst_12 {dimension_numbers = #tpu.dot_dimension_numbers<[1], [0], [0], [1], [0, 0, 1, 1], [], []>} : vector<256x4xbf16>, vector<4x128xbf16>, vector<256x128xf32> -> vector<256x128xf32>
    %20 = arith.addf %14, %19 : vector<256x128xf32>
    %c0_13 = arith.constant 0 : index
    %c0_14 = arith.constant 0 : index
    %c2 = arith.constant 2 : index
    %c0_15 = arith.constant 0 : index
    %21 = vector.load %arg2[%c0_13, %c0_14, %c2, %c0_15] : memref<1x20x20x4xbf16, #tpu.memory_space<vmem>>, vector<1x20x16x4xbf16>
    %22 = vector.shape_cast %21 : vector<1x20x16x4xbf16> to vector<20x16x4xbf16>
    %23 = vector.extract_strided_slice %22 {offsets = [0, 0, 0], sizes = [16, 16, 4], strides = [1, 1, 1]} : vector<20x16x4xbf16> to vector<16x16x4xbf16>
    %24 = vector.shape_cast %23 : vector<16x16x4xbf16> to vector<256x4xbf16>
    %c1 = arith.constant 1 : index
    %c0_16 = arith.constant 0 : index
    %c0_17 = arith.constant 0 : index
    %25 = vector.load %arg3[%c1, %c0_16, %c0_17] : memref<9x4x128xbf16, #tpu.memory_space<vmem>>, vector<1x4x128xbf16>
    %26 = vector.shape_cast %25 : vector<1x4x128xbf16> to vector<4x128xbf16>
    %cst_18 = arith.constant dense<0.000000e+00> : vector<256x128xf32>
    %27 = tpu.matmul %24, %26, %cst_18 {dimension_numbers = #tpu.dot_dimension_numbers<[1], [0], [0], [1], [0, 0, 1, 1], [], []>} : vector<256x4xbf16>, vector<4x128xbf16>, vector<256x128xf32> -> vector<256x128xf32>
    %28 = arith.addf %20, %27 : vector<256x128xf32>
    %29 = vector.extract_strided_slice %22 {offsets = [2, 0, 0], sizes = [16, 16, 4], strides = [1, 1, 1]} : vector<20x16x4xbf16> to vector<16x16x4xbf16>
    %30 = vector.shape_cast %29 : vector<16x16x4xbf16> to vector<256x4xbf16>
    %c4 = arith.constant 4 : index
    %c0_19 = arith.constant 0 : index
    %c0_20 = arith.constant 0 : index
    %31 = vector.load %arg3[%c4, %c0_19, %c0_20] : memref<9x4x128xbf16, #tpu.memory_space<vmem>>, vector<1x4x128xbf16>
    %32 = vector.shape_cast %31 : vector<1x4x128xbf16> to vector<4x128xbf16>
    %cst_21 = arith.constant dense<0.000000e+00> : vector<256x128xf32>
    %33 = tpu.matmul %30, %32, %cst_21 {dimension_numbers = #tpu.dot_dimension_numbers<[1], [0], [0], [1], [0, 0, 1, 1], [], []>} : vector<256x4xbf16>, vector<4x128xbf16>, vector<256x128xf32> -> vector<256x128xf32>
    %34 = arith.addf %28, %33 : vector<256x128xf32>
    %35 = vector.extract_strided_slice %22 {offsets = [4, 0, 0], sizes = [16, 16, 4], strides = [1, 1, 1]} : vector<20x16x4xbf16> to vector<16x16x4xbf16>
    %36 = vector.shape_cast %35 : vector<16x16x4xbf16> to vector<256x4xbf16>
    %c7 = arith.constant 7 : index
    %c0_22 = arith.constant 0 : index
    %c0_23 = arith.constant 0 : index
    %37 = vector.load %arg3[%c7, %c0_22, %c0_23] : memref<9x4x128xbf16, #tpu.memory_space<vmem>>, vector<1x4x128xbf16>
    %38 = vector.shape_cast %37 : vector<1x4x128xbf16> to vector<4x128xbf16>
    %cst_24 = arith.constant dense<0.000000e+00> : vector<256x128xf32>
    %39 = tpu.matmul %36, %38, %cst_24 {dimension_numbers = #tpu.dot_dimension_numbers<[1], [0], [0], [1], [0, 0, 1, 1], [], []>} : vector<256x4xbf16>, vector<4x128xbf16>, vector<256x128xf32> -> vector<256x128xf32>
    %40 = arith.addf %34, %39 : vector<256x128xf32>
    %c0_25 = arith.constant 0 : index
    %c0_26 = arith.constant 0 : index
    %c4_27 = arith.constant 4 : index
    %c0_28 = arith.constant 0 : index
    %41 = vector.load %arg2[%c0_25, %c0_26, %c4_27, %c0_28] : memref<1x20x20x4xbf16, #tpu.memory_space<vmem>>, vector<1x20x16x4xbf16>
    %42 = vector.shape_cast %41 : vector<1x20x16x4xbf16> to vector<20x16x4xbf16>
    %43 = vector.extract_strided_slice %42 {offsets = [0, 0, 0], sizes = [16, 16, 4], strides = [1, 1, 1]} : vector<20x16x4xbf16> to vector<16x16x4xbf16>
    %44 = vector.shape_cast %43 : vector<16x16x4xbf16> to vector<256x4xbf16>
    %c2_29 = arith.constant 2 : index
    %c0_30 = arith.constant 0 : index
    %c0_31 = arith.constant 0 : index
    %45 = vector.load %arg3[%c2_29, %c0_30, %c0_31] : memref<9x4x128xbf16, #tpu.memory_space<vmem>>, vector<1x4x128xbf16>
    %46 = vector.shape_cast %45 : vector<1x4x128xbf16> to vector<4x128xbf16>
    %cst_32 = arith.constant dense<0.000000e+00> : vector<256x128xf32>
    %47 = tpu.matmul %44, %46, %cst_32 {dimension_numbers = #tpu.dot_dimension_numbers<[1], [0], [0], [1], [0, 0, 1, 1], [], []>} : vector<256x4xbf16>, vector<4x128xbf16>, vector<256x128xf32> -> vector<256x128xf32>
    %48 = arith.addf %40, %47 : vector<256x128xf32>
    %49 = vector.extract_strided_slice %42 {offsets = [2, 0, 0], sizes = [16, 16, 4], strides = [1, 1, 1]} : vector<20x16x4xbf16> to vector<16x16x4xbf16>
    %50 = vector.shape_cast %49 : vector<16x16x4xbf16> to vector<256x4xbf16>
    %c5 = arith.constant 5 : index
    %c0_33 = arith.constant 0 : index
    %c0_34 = arith.constant 0 : index
    %51 = vector.load %arg3[%c5, %c0_33, %c0_34] : memref<9x4x128xbf16, #tpu.memory_space<vmem>>, vector<1x4x128xbf16>
    %52 = vector.shape_cast %51 : vector<1x4x128xbf16> to vector<4x128xbf16>
    %cst_35 = arith.constant dense<0.000000e+00> : vector<256x128xf32>
    %53 = tpu.matmul %50, %52, %cst_35 {dimension_numbers = #tpu.dot_dimension_numbers<[1], [0], [0], [1], [0, 0, 1, 1], [], []>} : vector<256x4xbf16>, vector<4x128xbf16>, vector<256x128xf32> -> vector<256x128xf32>
    %54 = arith.addf %48, %53 : vector<256x128xf32>
    %55 = vector.extract_strided_slice %42 {offsets = [4, 0, 0], sizes = [16, 16, 4], strides = [1, 1, 1]} : vector<20x16x4xbf16> to vector<16x16x4xbf16>
    %56 = vector.shape_cast %55 : vector<16x16x4xbf16> to vector<256x4xbf16>
    %c8 = arith.constant 8 : index
    %c0_36 = arith.constant 0 : index
    %c0_37 = arith.constant 0 : index
    %57 = vector.load %arg3[%c8, %c0_36, %c0_37] : memref<9x4x128xbf16, #tpu.memory_space<vmem>>, vector<1x4x128xbf16>
    %58 = vector.shape_cast %57 : vector<1x4x128xbf16> to vector<4x128xbf16>
    %cst_38 = arith.constant dense<0.000000e+00> : vector<256x128xf32>
    %59 = tpu.matmul %56, %58, %cst_38 {dimension_numbers = #tpu.dot_dimension_numbers<[1], [0], [0], [1], [0, 0, 1, 1], [], []>} : vector<256x4xbf16>, vector<4x128xbf16>, vector<256x128xf32> -> vector<256x128xf32>
    %60 = arith.addf %54, %59 : vector<256x128xf32>
    %c0_39 = arith.constant 0 : index
    %c0_40 = arith.constant 0 : index
    %61 = vector.load %arg4[%c0_39, %c0_40] : memref<1x128xf32, #tpu.memory_space<vmem>>, vector<1x128xf32>
    %62 = vector.broadcast %61 : vector<1x128xf32> to vector<256x128xf32>
    %63 = arith.addf %60, %62 : vector<256x128xf32>
    %cst_41 = arith.constant 0.000000e+00 : f32
    %64 = vector.broadcast %cst_41 : f32 to vector<256x128xf32>
    %65 = arith.maximumf %63, %64 : vector<256x128xf32>
    %c0_42 = arith.constant 0 : index
    %c0_43 = arith.constant 0 : index
    %c0_44 = arith.constant 0 : index
    %66 = vector.load %arg5[%c0_42, %c0_43, %c0_44] : memref<1x256x128xf32, #tpu.memory_space<vmem>>, vector<1x256x128xf32>
    %67 = vector.shape_cast %66 : vector<1x256x128xf32> to vector<256x128xf32>
    %68 = vector.shape_cast %65 : vector<256x128xf32> to vector<1x256x128xf32>
    tpu.vector_store %arg5[%c0_42, %c0_43, %c0_44], %68 {strides = array<i32>} : memref<1x256x128xf32, #tpu.memory_space<vmem>>, vector<1x256x128xf32>,
    return
  }
  func.func @transform_0(%arg0: i32, %arg1: i32) -> (i32, i32, i32, i32) {
    %c0_i32 = arith.constant 0 : i32
    %c0_i32_0 = arith.constant 0 : i32
    %c0_i32_1 = arith.constant 0 : i32
    %c0_i32_2 = arith.constant 0 : i32
    return %arg0, %c0_i32, %c0_i32_0, %c0_i32_1 : i32, i32, i32, i32
  }
  func.func @transform_1(%arg0: i32, %arg1: i32) -> (i32, i32, i32) {
    %c0_i32 = arith.constant 0 : i32
    %c0_i32_0 = arith.constant 0 : i32
    %c0_i32_1 = arith.constant 0 : i32
    return %c0_i32, %c0_i32_0, %arg1 : i32, i32, i32
  }
  func.func @transform_2(%arg0: i32, %arg1: i32) -> (i32, i32) {
    %c0_i32 = arith.constant 0 : i32
    %c0_i32_0 = arith.constant 0 : i32
    return %c0_i32, %arg1 : i32, i32
  }
  func.func @transform_3(%arg0: i32, %arg1: i32) -> (i32, i32, i32) {
    %c0_i32 = arith.constant 0 : i32
    %c0_i32_0 = arith.constant 0 : i32
    return %arg0, %c0_i32, %arg1 : i32, i32, i32
  }
}

</mosaic_0001>

<bundles_post_ra>
// kernel: aspp_forward.1
= control target key start
LH: loop header
LB: loop body
LE: loop exit
PB: predicated region body
PF: predicated region fallthrough
CT: control target
= control target key end

     0   :  { %s4158_s12 = smov 0   ;;  %s4160_s13 = smov 0   ;;  %s5088_s0 = inlined_call_operand.vmem [shape: bf16[2,20,20,4], index: 0, kind: input, shape index: {}]   ;;  %s5089_s1 = inlined_call_operand.vmem [shape: bf16[9,4,128], index: 1, kind: input, shape index: {}]   ;;  %s5090_s2 = inlined_call_operand.vmem [shape: f32[1,128], index: 2, kind: input, shape index: {}]   ;;  %s5091_s3 = inlined_call_operand.vmem [shape: f32[2,256,128], index: 3, kind: output, shape index: {}]  }
   0x1   :  { %s4162_s14 = smov 0  }
   0x2 LB: > { %s25_s15 = sadd.s32 1, %s4132_s13  ;;  %p3082_p0 = scmp.ge.s32.totalorder %s4136_s14, 1  ;;  %s4136_s14 = sphi %s4162_s14, %s13_s14   ;;  %s4132_s13 = sphi %s4160_s13, %s5142_s13   ;;  %s4128_s12 = sphi %s4158_s12, %s5141_s12  }
   0x3   : > { %p27_p1 = scmp.ge.s32.totalorder %s25_s15, 2  ;;  %p168_p2 = scmp.lt.s32.totalorder %s4136_s14, 3 }
   0x5   : > { %s5144_s15 = smov (%p27_p1, %s25_s15), 0  ;;  %p169_p3 = pnand %p3082_p0, %p168_p2 }
   0x7   : > { %172 = sbr.rel (%p169_p3) target bundleno = 532 (0x214), region = 32 }
   0xe   : > { %v3086_v0 = vld [vmem:[%s5089_s1 + $0x6] sm:$0x3]  ;;  %vm395_vm0 = vcmask 1041408   ;;  %p202_p4 = scmp.lt.s32.totalorder %s4128_s12, 1  ;;  %v4184_v2 = vld [vmem:[%s5089_s1 + $0x8] sm:$0x3] }
   0xf   : > { %4059 = vmatprep.subr.msk.bf16.mxu1 %vm395_vm0, %v3086_v0  ;;  %v397_v1 = vsel %vm395_vm0, %v3086_v0, 0  ;;  %v263_v3 = vld [vmem:[%s5089_s1] sm:$0x3]  ;;  %4063 = vmatprep.subr.msk.bf16.mxu0 %vm395_vm0, %v4184_v2  ;;  %v4195_v4 = vsel %vm395_vm0, %v4184_v2, 0  ;;  %v3228_v5 = vld [vmem:[%s5089_s1 + $0xe] sm:$0x3] }
  0x10   : > { %3496 = vmatpush3.bf16.msra.mxu1 %v397_v1  ;;  %s5146_s12 = smov (!%p202_p4, %s4128_s12), 1  ;;  %3632 = vmatpush3.bf16.msra.mxu0 %v4195_v4  ;;  %vm1062_vm1 = vcmask 1042432   ;;  %vm1063_vm2 = vcmask 1046532   ;;  %vm346_vm3 = vcmask 31744   ;;  %v4219_v8 = vld [vmem:[%s5089_s1 + $0xc] sm:$0x3] }
  0x11   : > { %4060 = vmatprep.subr.msk.bf16.mxu1 %vm395_vm0, %v263_v3  ;;  %s4069_s24 = smul.u32 240, %s5146_s12  ;;  %4065 = vmatprep.subr.msk.bf16.mxu0 %vm395_vm0, %v3228_v5  ;;  %vm4209_vm4 = vmor %vm1062_vm1, %vm1063_vm2  ;;  %v577_v10 = vsel %vm395_vm0, %v263_v3, 0  ;;  %v1736_v26 = vsel %vm395_vm0, %v3228_v5, 0  ;;  %v4278_v42 = vld [vmem:[%s5089_s1 + $0x4] sm:$0x3]  ;;  %vm2004_vm5 = vcmask 1045508  }
  0x12   : > { %vm4601_vm6 = vmor %vm395_vm0, %vm2004_vm5  ;;  %s3341_s17 = sshll.u32 %s5146_s12, 8 }
  0x13   : > { %s4207_s27 = scalar_lea.vmem %s5088_s0, %s4069_s24  ;;  %s5010_s20 = scalar_lea.vmem %s5091_s3, %s3341_s17 }
  0x14   : > { %v4214_v7 = vld [vmem:[%s4207_s27 + $0x18] sm:$0xff]   ;;  %v4222_v9 = vld [vmem:[%s4207_s27 + $0x24] sm:$0xff]   ;;  %v962_v13 = vld [vmem:[%s4207_s27 + $0x20] sm:$0x1] }
  0x15   : > { %3497 = vmatprep.mubr.msk.bf16.mxu1 %vm346_vm3, %v4214_v7  ;;  %v960_v11 = vld [vmem:[%s4207_s27 + $0x18] sm:$0xe]  ;;  %v4229_v12 = vld [vmem:[%s4207_s27 + $0x1c] sm:$0xf]  ;;  %v1084_v16 = vrot.slane %v962_v13, 5  ;;  %v4241_v21 = vld [vmem:[%s4207_s27 + $0x30] sm:$0xff]  }
  0x16   : > { %3498 = vmatmul.mubr.msk.bf16.vlgmr.msra.gmra.mrb[0].mxu1 %vm346_vm3, %v4222_v9  ;;  %v3158_v14 = vrot.slane %v960_v11, 9  ;;  %v1081_v15 = vrot.slane %v4229_v12, 5  ;;  %v963_v17 = vld [vmem:[%s4207_s27 + $0x24] sm:$0xe]  ;;  %v4237_v18 = vld [vmem:[%s4207_s27 + $0x28] sm:$0xf] }
  0x17   : > { %3530 = vmatpush3.bf16.msra.mxu1 %v577_v10  ;;  %v965_v19 = vld [vmem:[%s4207_s27 + $0x2c] sm:$0x1]  ;;  %v3159_v20 = vrot.slane %v963_v17, 9  ;;  %v1088_v24 = vrot.slane %v4237_v18, 5  ;;  %3501 = vmatprep.mubr.msk.bf16.mxu1 %vm346_vm3, %v4241_v21  ;;  %v4256_v30 = vld [vmem:[%s4207_s27 + $0x3c] sm:$0xff]   ;;  %v4300_v54 = vld [vmem:[%s4207_s27 + $0x54] sm:$0xff]  }
  0x18   : > { %v1082_v22 = vsel %vm4209_vm4, %v3158_v14, %v1081_v15  ;;  %v1083_v23 = vrot.slane %v1081_v15, 4  ;;  %4061 = vmatprep.subr.msk.bf16.mxu1 %vm395_vm0, %v4219_v8  ;;  %v1091_v25 = vrot.slane %v965_v19, 5  ;;  %v966_v31 = vld [vmem:[%s4207_s27 + $0x30] sm:$0xe]  ;;  %v4262_v33 = vld [vmem:[%s4207_s27 + $0x34] sm:$0xf] }
  0x19   : > { %v1089_v28 = vsel %vm4209_vm4, %v3159_v20, %v1088_v24  ;;  %v1090_v29 = vrot.slane %v1088_v24, 4  ;;  %v968_v34 = vld [vmem:[%s4207_s27 + $0x38] sm:$0x1]  ;;  %v3160_v35 = vrot.slane %v966_v31, 9  ;;  %v4266_v36 = vld [vmem:[%s4207_s27 + $0x48] sm:$0xff]   ;;  %v1095_v38 = vrot.slane %v4262_v33, 5 }
  0x1a   : > { %v1085_v27 = vsel %vm4209_vm4, %v1083_v23, %v1084_v16  ;;  %v1098_v39 = vrot.slane %v968_v34, 5  ;;  %v969_v40 = vld [vmem:[%s4207_s27 + $0x3c] sm:$0xe]  ;;  %v4273_v41 = vld [vmem:[%s4207_s27 + $0x40] sm:$0xf]  ;;  %v4355_v31 = vld [vmem:[%s4207_s27 + $0x6c] sm:$0xff]  }
  0x1b   : > { %v4259_v32 = vcombine.low %v1082_v22, %v1085_v27  ;;  %v1092_v37 = vsel %vm4209_vm4, %v1090_v29, %v1091_v25  ;;  %v971_v44 = vld [vmem:[%s4207_s27 + $0x44] sm:$0x1]  ;;  %v3161_v45 = vrot.slane %v969_v40, 9  ;;  %v1102_v46 = vrot.slane %v4273_v41, 5  ;;  %v972_v51 = vld [vmem:[%s4207_s27 + $0x48] sm:$0xe] }
  0x1c   : > { %v4282_v43 = vcombine.low %v1089_v28, %v1092_v37  ;;  %v1096_v47 = vsel %vm4209_vm4, %v3160_v35, %v1095_v38  ;;  %v1097_v48 = vrot.slane %v1095_v38, 4  ;;  %v1105_v49 = vrot.slane %v971_v44, 5  ;;  %v4303_v55 = vld [vmem:[%s4207_s27 + $0x4c] sm:$0xf]  ;;  %v974_v56 = vld [vmem:[%s4207_s27 + $0x50] sm:$0x1] }
  0x1d   : > { %3633 = vmatprep.mubr.msk.bf16.mxu0 %vm346_vm3, %v4259_v32  ;;  %v1104_v50 = vrot.slane %v1102_v46, 4  ;;  %v1103_v53 = vsel %vm4209_vm4, %v3161_v45, %v1102_v46  ;;  %v3162_v57 = vrot.slane %v972_v51, 9  ;;  %v1109_v60 = vrot.slane %v4303_v55, 5  ;;  %v975_v62 = vld [vmem:[%s4207_s27 + $0x54] sm:$0xe]  ;;  %v4320_v3 = vld [vmem:[%s4207_s27 + $0x60] sm:$0xff]  }
  0x1e   : > { %3502 = vmatmul.mubr.msk.bf16.gmra.mrb[4].mxu1 %vm346_vm3, %v4256_v30  ;;  %3634 = vmatmul.mubr.msk.bf16.vlgmr.msra.gmra.mrb[0].mxu0 %vm346_vm3, %v4282_v43  ;;  %v1099_v52 = vsel %vm4209_vm4, %v1097_v48, %v1098_v39  ;;  %v1112_v61 = vrot.slane %v974_v56, 5  ;;  %v4313_v63 = vld [vmem:[%s4207_s27 + $0x58] sm:$0xf]  ;;  %v977_v0 = vld [vmem:[%s4207_s27 + $0x5c] sm:$0x1]  ;;  %v3163_v13 = vrot.slane %v975_v62, 9 }
  0x1f   : > { %3505 = vmatprep.mubr.msk.bf16.mxu1 %vm346_vm3, %v4266_v36  ;;  %3666 = vmatpush3.bf16.msra.mxu0 %v1736_v26  ;;  %v4306_v58 = vcombine.low %v1096_v47, %v1099_v52  ;;  %v1106_v59 = vsel %vm4209_vm4, %v1104_v50, %v1105_v49  ;;  %v1116_v1 = vrot.slane %v4313_v63, 5  ;;  %v1110_v10 = vsel %vm4209_vm4, %v3162_v57, %v1109_v60  ;;  %v978_v16 = vld [vmem:[%s4207_s27 + $0x60] sm:$0xe]  ;;  %v4332_v19 = vld [vmem:[%s4207_s27 + $0x64] sm:$0xf]  ;;  %v4366_v45 = vld [vmem:[%s4207_s27 + $0x78] sm:$0xff]  }
  0x20   : > { %4066 = vmatprep.subr.msk.bf16.mxu0 %vm395_vm0, %v4278_v42  ;;  %v4324_v5 = vcombine.low %v1103_v53, %v1106_v59  ;;  %v1111_v11 = vrot.slane %v1109_v60, 4  ;;  %v1119_v15 = vrot.slane %v977_v0, 5  ;;  %v980_v20 = vld [vmem:[%s4207_s27 + $0x68] sm:$0x1]  ;;  %v3164_v22 = vrot.slane %v978_v16, 9  ;;  %v4386_v52 = vld [vmem:[%s4207_s27 + $0x90] sm:$0xff]  }
  0x21   : > { %3637 = vmatprep.mubr.msk.bf16.mxu0 %vm346_vm3, %v4306_v58  ;;  %v1118_v14 = vrot.slane %v1116_v1, 4  ;;  %v1123_v24 = vrot.slane %v4332_v19, 5  ;;  %v1126_v25 = vrot.slane %v980_v20, 5  ;;  %v4341_v26 = vld [vmem:[%s4207_s27 + $0x70] sm:$0xf]  ;;  %v1117_v28 = vsel %vm4209_vm4, %v3163_v13, %v1116_v1  ;;  %v4383_v51 = vld [vmem:[%s4207_s27 + $0x84] sm:$0xff]  }
  0x22   : > { %v1113_v17 = vsel %vm4209_vm4, %v1111_v11, %v1112_v61  ;;  %v981_v27 = vld [vmem:[%s4207_s27 + $0x6c] sm:$0xe]  ;;  %v1130_v35 = vrot.slane %v4341_v26, 5  ;;  %v983_v38 = vld [vmem:[%s4207_s27 + $0x74] sm:$0x1]  ;;  %v4399_v56 = vld [vmem:[%s4207_s27 + $0x9c] sm:$0xff]  }
  0x23   : > { %v4337_v23 = vcombine.low %v1110_v10, %v1113_v17  ;;  %v1120_v29 = vsel %vm4209_vm4, %v1118_v14, %v1119_v15  ;;  %v1125_v34 = vrot.slane %v1123_v24, 4  ;;  %v1124_v37 = vsel %vm4209_vm4, %v3164_v22, %v1123_v24  ;;  %v4402_v57 = vld [vmem:[%s4207_s27 + $0xa8] sm:$0xff]   ;;  %v4409_v60 = vld [vmem:[%s4207_s27 + $0x7c] sm:$0xf]  ;;  %v4426_v62 = vld [vmem:[%s4207_s27 + $0xb4] sm:$0xff]  }
  0x24   : > { %v4363_v40 = vcombine.low %v1117_v28, %v1120_v29  ;;  %v3165_v44 = vrot.slane %v981_v27, 9  ;;  %v1132_v47 = vrot.slane %v1130_v35, 4  ;;  %v1133_v48 = vrot.slane %v983_v38, 5  ;;  %v4414_v61 = vld [vmem:[%s5089_s1 + $0xa] sm:$0x3]  ;;  %v4431_v10 = vld [vmem:[%s4207_s27 + $0xc0] sm:$0xff]  }
  0x25   : > { %v1127_v39 = vsel %vm4209_vm4, %v1125_v34, %v1126_v25  ;;  %v2217_v59 = vsel %vm395_vm0, %v4278_v42, 0  ;;  %v1137_v42 = vrot.slane %v4409_v60, 5  ;;  %v984_v0 = vld [vmem:[%s4207_s27 + $0x78] sm:$0xe]  ;;  %v986_v1 = vld [vmem:[%s4207_s27 + $0x80] sm:$0x1] }
  0x26   : > { %3506 = vmatmul.mubr.msk.bf16.gmra.mrb[8].mxu1 %vm346_vm3, %v4300_v54  ;;  %3638 = vmatmul.mubr.msk.bf16.gmra.mrb[4].mxu0 %vm346_vm3, %v4324_v5  ;;  %5113 = vst [vmem:[#allocation2_spill] sm:$0xff] %v4363_v40  ;;  %v4368_v46 = vcombine.low %v1124_v37, %v1127_v39  ;;  %v1131_v49 = vsel %vm4209_vm4, %v3165_v44, %v1130_v35  ;;  %v3166_v11 = vrot.slane %v984_v0, 9  ;;  %v1140_v14 = vrot.slane %v986_v1, 5  ;;  %v4434_v15 = vld [vmem:[%s4207_s27 + $0x88] sm:$0xf]  ;;  %v4456_v28 = vld [vmem:[%s4207_s27 + $0xcc] sm:$0xff]  }
  0x27   : > { %3509 = vmatprep.mubr.msk.bf16.mxu1 %vm346_vm3, %v4320_v3  ;;  %3641 = vmatprep.mubr.msk.bf16.mxu0 %vm346_vm3, %v4337_v23  ;;  %v1134_v50 = vsel %vm4209_vm4, %v1132_v47, %v1133_v48  ;;  %v1139_v13 = vrot.slane %v1137_v42, 4  ;;  %v4439_v16 = vld [vmem:[%s4207_s27 + $0x94] sm:$0xf]  ;;  %v1144_v17 = vrot.slane %v4434_v15, 5  ;;  %v987_v24 = vld [vmem:[%s4207_s27 + $0x84] sm:$0xe] }
  0x28   : > { %5114 = vst [vmem:[#allocation3_spill] sm:$0xff] %v4368_v46  ;;  %v4388_v53 = vcombine.low %v1131_v49, %v1134_v50  ;;  %v1138_v20 = vsel %vm4209_vm4, %v3166_v11, %v1137_v42  ;;  %v989_v25 = vld [vmem:[%s4207_s27 + $0x8c] sm:$0x1]  ;;  %v1151_v27 = vrot.slane %v4439_v16, 5  ;;  %v990_v29 = vld [vmem:[%s4207_s27 + $0x90] sm:$0xe] }
  0x29   : > { %v1141_v22 = vsel %vm4209_vm4, %v1139_v13, %v1140_v14  ;;  %v992_v34 = vld [vmem:[%s4207_s27 + $0x98] sm:$0x1]  ;;  %v4110_v35 = vld [vmem:[%s4207_s27] sm:$0xff]   ;;  %v3167_v38 = vrot.slane %v987_v24, 9  ;;  %v1146_v39 = vrot.slane %v1144_v17, 4  ;;  %v1147_v44 = vrot.slane %v989_v25, 5 }
  0x2a   : > { %5115 = vst [vmem:[#allocation4_spill] sm:$0xff] %v4388_v53  ;;  %v4461_v37 = vcombine.low %v1138_v20, %v1141_v22  ;;  %v3168_v47 = vrot.slane %v990_v29, 9  ;;  %v1153_v48 = vrot.slane %v1151_v27, 4  ;;  %v1154_v49 = vrot.slane %v992_v34, 5  ;;  %v4464_v50 = vld [vmem:[%s4207_s27 + $0xa0] sm:$0xf] }
  0x2b   : > { %v1145_v42 = vsel %vm4209_vm4, %v3167_v38, %v1144_v17  ;;  %v1148_v0 = vsel %vm4209_vm4, %v1146_v39, %v1147_v44  ;;  %v1158_v1 = vrot.slane %v4464_v50, 5  ;;  %v993_v14 = vld [vmem:[%s4207_s27 + $0x9c] sm:$0xe]  ;;  %v995_v20 = vld [vmem:[%s4207_s27 + $0xa4] sm:$0x1]  ;;  %v4111_v24 = vld [vmem:[%s4207_s27 + $0xc] sm:$0xff]  }
  0x2c   : > { %5116 = vst [vmem:[#allocation5_spill] sm:$0xff] %v4461_v37  ;;  %v1152_v11 = vsel %vm4209_vm4, %v3168_v47, %v1151_v27  ;;  %v1155_v13 = vsel %vm4209_vm4, %v1153_v48, %v1154_v49  ;;  %v996_v25 = vld [vmem:[%s4207_s27 + $0xa8] sm:$0xe]  ;;  %v998_v17 = vld [vmem:[%s4207_s27 + $0xb0] sm:$0x1]  ;;  %v4491_v29 = vcombine.low %v1145_v42, %v1148_v0  ;;  %v759_v34 = vsel %vm395_vm0, %v4219_v8, 0 }
  0x2d   : > { %v3169_v27 = vrot.slane %v993_v14, 9  ;;  %v1160_v38 = vrot.slane %v1158_v1, 4  ;;  %v1161_v39 = vrot.slane %v995_v20, 5  ;;  %v3170_v44 = vrot.slane %v996_v25, 9  ;;  %v4498_v49 = vld [vmem:[%s4207_s27 + $0xb8] sm:$0xf] }
  0x2e   : > { %3510 = vmatmul.mubr.msk.bf16.gmra.mrb[12].mxu1 %vm346_vm3, %v4355_v31  ;;  %3642 = vmatmul.mubr.msk.bf16.gmra.mrb[8].mxu0 %vm346_vm3, %v4363_v40  ;;  %5117 = vst [vmem:[#allocation6_spill] sm:$0xff] %v4491_v29  ;;  %v1168_v48 = vrot.slane %v998_v17, 5  ;;  %v4502_v42 = vld [vmem:[%s4207_s27 + $0xc4] sm:$0xf]  ;;  %v4507_v8 = vld [vmem:[%s5089_s1 + $0x2] sm:$0x3] }
  0x2f   : > { %3513 = vmatprep.mubr.msk.bf16.mxu1 %vm346_vm3, %v4366_v45  ;;  %3645 = vmatprep.mubr.msk.bf16.mxu0 %vm346_vm3, %v4368_v46  ;;  %v1159_v0 = vsel %vm4209_vm4, %v3169_v27, %v1158_v1  ;;  %v1001_v25 = vld [vmem:[%s4207_s27 + $0xbc] sm:$0x1]  ;;  %v1479_v1 = vrot.slane %v4502_v42, 5  ;;  %v1002_v17 = vld [vmem:[%s4207_s27 + $0xc0] sm:$0xe] }
  0x30   : > { %v1963_v6 = vld [vmem:[%s4207_s27 + $0xc0] sm:$0xc] }
  0x36   : > { %3514 = vmatmul.mubr.msk.bf16.gmra.mrb[16].mxu1 %vm346_vm3, %v4383_v51  ;;  %3646 = vmatmul.mubr.msk.bf16.gmra.mrb[12].mxu0 %vm346_vm3, %v4388_v53 }
  0x37   : > { %3517 = vmatprep.mubr.msk.bf16.mxu1 %vm346_vm3, %v4386_v52  ;;  %3667 = vmatprep.mubr.msk.bf16.mxu0 %vm346_vm3, %v4306_v58 }
  0x3e   : > { %3518 = vmatmul.mubr.msk.bf16.gmra.mrb[20].mxu1 %vm346_vm3, %v4399_v56  ;;  %3668 = vmatmul.mubr.msk.bf16.vlgmr.msra.gmra.mrb[0].mxu0 %vm346_vm3, %v4324_v5 }
  0x3f   : > { %3521 = vmatprep.mubr.msk.bf16.mxu1 %vm346_vm3, %v4402_v57  ;;  %3700 = vmatpush3.bf16.msra.mxu0 %v2217_v59  ;;  %v4469_v59 = vld [vmem:[%s4207_s27 + $0xac] sm:$0xf] }
  0x40   : > { %3671 = vmatprep.mubr.msk.bf16.mxu0 %vm346_vm3, %v4337_v23  ;;  %4067 = vmatprep.subr.msk.bf16.mxu0 %vm395_vm0, %v4414_v61  ;;  %v1165_v22 = vrot.slane %v4469_v59, 5 }
  0x42   : > { %v1167_v47 = vrot.slane %v1165_v22, 4  ;;  %v1166_v14 = vsel %vm4209_vm4, %v3170_v44, %v1165_v22  ;;  %v3205_v44 = vrot.slane %v1002_v17, 9 }
  0x44   : > { %v1169_v20 = vsel %vm4209_vm4, %v1167_v47, %v1168_v48  ;;  %v1481_v47 = vrot.slane %v1479_v1, 4 }
  0x45   : > { %v4533_v27 = vcombine.low %v1166_v14, %v1169_v20 }
  0x46   : > { %3522 = vmatmul.mubr.msk.bf16.gmra.mrb[24].mxu1 %vm346_vm3, %v4426_v62  ;;  %3672 = vmatmul.mubr.msk.bf16.gmra.mrb[4].mxu0 %vm346_vm3, %v4363_v40 }
  0x47   : > { %3525 = vmatprep.mubr.msk.bf16.mxu1 %vm346_vm3, %v4431_v10  ;;  %3675 = vmatprep.mubr.msk.bf16.mxu0 %vm346_vm3, %v4368_v46  ;;  %5120 = vst [vmem:[#allocation9_spill] sm:$0xff] %v4533_v27 }
  0x4e   : > { %3526 = vmatmul.mubr.msk.bf16.gmra.mrb[28].mxu1 %vm346_vm3, %v4456_v28  ;;  %3676 = vmatmul.mubr.msk.bf16.gmra.mrb[8].mxu0 %vm346_vm3, %v4388_v53 }
  0x4f   : > { %3531 = vmatprep.mubr.msk.bf16.mxu1 %vm346_vm3, %v4110_v35  ;;  %3679 = vmatprep.mubr.msk.bf16.mxu0 %vm346_vm3, %v4461_v37  ;;  %v4495_v35 = vcombine.low %v1152_v11, %v1155_v13  ;;  %v1162_v11 = vsel %vm4209_vm4, %v1160_v38, %v1161_v39  ;;  %v1172_v13 = vrot.slane %v4498_v49, 5  ;;  %v1175_v39 = vrot.slane %v1001_v25, 5  ;;  %v1007_v25 = vld [vmem:[%s4207_s27 + $0xd4] sm:$0x1] }
  0x51   : > { %5118 = vst [vmem:[#allocation7_spill] sm:$0xff] %v4495_v35  ;;  %v1174_v22 = vrot.slane %v1172_v13, 4 }
  0x56   : > { %3532 = vmatmul.mubr.msk.bf16.vlgmr.msra.gmra.mrb[0].mxu1 %vm346_vm3, %v4111_v24  ;;  %3680 = vmatmul.mubr.msk.bf16.gmra.mrb[12].mxu0 %vm346_vm3, %v4491_v29  ;;  %v999_v24 = vld [vmem:[%s4207_s27 + $0xb4] sm:$0xe]  ;;  %v4541_v29 = vld [vmem:[%s4207_s27 + $0xdc] sm:$0xf] }
  0x57   : > { %3564 = vmatpush3.bf16.msra.mxu1 %v759_v34  ;;  %3683 = vmatprep.mubr.msk.bf16.mxu0 %vm346_vm3, %v4495_v35  ;;  %v1004_v34 = vld [vmem:[%s4207_s27 + $0xc8] sm:$0x1]  ;;  %v3171_v38 = vrot.slane %v999_v24, 9  ;;  %v4536_v35 = vld [vmem:[%s4207_s27 + $0xd0] sm:$0xf]  ;;  %5121 = vst [vmem:[#allocation10_spill] sm:$0xff] %v4541_v29 }
  0x58   : > { %3535 = vmatprep.mubr.msk.bf16.mxu1 %vm346_vm3, %v4214_v7  ;;  %4062 = vmatprep.subr.msk.bf16.mxu1 %vm395_vm0, %v4507_v8  ;;  %v4531_v7 = vcombine.low %v1159_v0, %v1162_v11  ;;  %v1482_v48 = vrot.slane %v1004_v34, 5  ;;  %v1176_v11 = vsel %vm4209_vm4, %v1174_v22, %v1175_v39  ;;  %v1486_v14 = vrot.slane %v4536_v35, 5  ;;  %v1005_v24 = vld [vmem:[%s4207_s27 + $0xcc] sm:$0xe]  ;;  %v1008_v34 = vld [vmem:[%s4207_s27 + $0xd8] sm:$0xe] }
  0x59   : > { %v1173_v0 = vsel %vm4209_vm4, %v3171_v38, %v1172_v13  ;;  %v1709_v17 = vrot.slane %v4541_v29, 5  ;;  %v3206_v22 = vrot.slane %v1005_v24, 9  ;;  %v4573_v29 = vld [vmem:[%s4207_s27 + $0x4] sm:$0xf] }
  0x5a   : > { %5119 = vst [vmem:[#allocation8_spill] sm:$0xff] %v4531_v7  ;;  %v1483_v20 = vsel %vm4209_vm4, %v1481_v47, %v1482_v48  ;;  %v4563_v13 = vcombine.low %v1173_v0, %v1176_v11  ;;  %v1488_v39 = vrot.slane %v1486_v14, 4  ;;  %v4568_v48 = vld [vmem:[%s4207_s27 + $0xe8] sm:$0xf]  ;;  %v1011_v24 = vld [vmem:[%s4207_s27 + $0xe4] sm:$0xe] }
  0x5b   : > { %5124 = vst [vmem:[#allocation13_spill] sm:$0xff] %v4568_v48  ;;  %v1716_v11 = vrot.slane %v4568_v48, 5 }
  0x5c   : > { %5122 = vst [vmem:[#allocation11_spill] sm:$0xff] %v4563_v13 }
  0x5e   : > { %3536 = vmatmul.mubr.msk.bf16.gmra.mrb[4].mxu1 %vm346_vm3, %v4222_v9  ;;  %3684 = vmatmul.mubr.msk.bf16.gmra.mrb[16].mxu0 %vm346_vm3, %v4531_v7  ;;  %v1480_v9 = vsel %vm4209_vm4, %v3205_v44, %v1479_v1  ;;  %v1489_v7 = vrot.slane %v1007_v25, 5  ;;  %v3226_v1 = vrot.slane %v1008_v34, 9  ;;  %v1711_v44 = vrot.slane %v1709_v17, 4  ;;  %v1013_v25 = vld [vmem:[%s4207_s27 + $0xec] sm:$0x1] }
  0x5f   : > { %3539 = vmatprep.mubr.msk.bf16.mxu1 %vm346_vm3, %v4241_v21  ;;  %3687 = vmatprep.mubr.msk.bf16.mxu0 %vm346_vm3, %v4533_v27  ;;  %v1010_v27 = vld [vmem:[%s4207_s27 + $0xe0] sm:$0x1]  ;;  %v4565_v38 = vcombine.low %v1480_v9, %v1483_v20  ;;  %v2008_v34 = vrot.slane %v4573_v29, 6  ;;  %v1719_v48 = vrot.slane %v1013_v25, 5  ;;  %v1934_v25 = vld [vmem:[%s4207_s27 + $0x14] sm:$0x3] }
  0x60   : > { %v1712_v47 = vrot.slane %v1010_v27, 5  ;;  %v1487_v27 = vsel %vm4209_vm4, %v3206_v22, %v1486_v14  ;;  %v1490_v0 = vsel %vm4209_vm4, %v1488_v39, %v1489_v7  ;;  %v1710_v9 = vsel %vm4209_vm4, %v3226_v1, %v1709_v17 }
  0x61   : > { %5123 = vst [vmem:[#allocation12_spill] sm:$0xff] %v4565_v38  ;;  %v4595_v14 = vcombine.low %v1487_v27, %v1490_v0  ;;  %v3227_v7 = vrot.slane %v1011_v24, 9  ;;  %v1718_v39 = vrot.slane %v1716_v11, 4  ;;  %v2010_v17 = vrot.slane %v2008_v34, 4  ;;  %v1933_v24 = vld [vmem:[%s4207_s27 + $0xc] sm:$0xc] }
  0x62   : > { %v1713_v20 = vsel %vm4209_vm4, %v1711_v44, %v1712_v47  ;;  %v4598_v44 = vld [vmem:[%s4207_s27 + $0x10] sm:$0xf]  ;;  %v2022_v0 = vrot.slane %v4229_v12, 6 }
  0x63   : > { %5125 = vst [vmem:[#allocation14_spill] sm:$0xff] %v4595_v14  ;;  %v3229_v22 = vcombine.low %v1710_v9, %v1713_v20  ;;  %v2015_v27 = vrot.slane %v4598_v44, 6 }
  0x66   : > { %3540 = vmatmul.mubr.msk.bf16.gmra.mrb[8].mxu1 %vm346_vm3, %v4256_v30  ;;  %3688 = vmatmul.mubr.msk.bf16.gmra.mrb[20].mxu0 %vm346_vm3, %v4563_v13  ;;  %v1932_v13 = vld [vmem:[%s4207_s27 + $0x8] sm:$0x3] }
  0x67   : > { %3543 = vmatprep.mubr.msk.bf16.mxu1 %vm346_vm3, %v4266_v36  ;;  %3691 = vmatprep.mubr.msk.bf16.mxu0 %vm346_vm3, %v4565_v38  ;;  %v1931_v38 = vld [vmem:[%s4207_s27] sm:$0xc]  ;;  %v2011_v1 = vrot.slane %v1932_v13, 6  ;;  %v1717_v13 = vsel %vm4209_vm4, %v3227_v7, %v1716_v11  ;;  %v3248_v11 = vrot.slane %v1933_v24, 10  ;;  %v2018_v7 = vrot.slane %v1934_v25, 6 }
  0x68   : > { %v3247_v37 = vrot.slane %v1931_v38, 10  ;;  %v1720_v38 = vsel %vm4209_vm4, %v1718_v39, %v1719_v48  ;;  %v2017_v48 = vrot.slane %v2015_v27, 4  ;;  %v2024_v39 = vrot.slane %v2022_v0, 4 }
  0x69   : > { %v2012_v20 = vsel %vm4601_vm6, %v2010_v17, %v2011_v1  ;;  %v3230_v53 = vcombine.low %v1717_v13, %v1720_v38  ;;  %v2029_v17 = vrot.slane %v4237_v18, 6  ;;  %v1938_v13 = vld [vmem:[%s4207_s27 + $0x2c] sm:$0x3]  ;;  %v2036_v38 = vrot.slane %v4262_v33, 6  ;;  %v4655_v33 = vld [vmem:[%s5089_s1 + $0x10] sm:$0x3] }
  0x6a   : > { %v2009_v9 = vsel %vm4601_vm6, %v3247_v37, %v2008_v34  ;;  %v2016_v37 = vsel %vm4601_vm6, %v3248_v11, %v2015_v27  ;;  %v2019_v34 = vsel %vm4601_vm6, %v2017_v48, %v2018_v7  ;;  %v2445_v18 = vsel %vm395_vm0, %v4414_v61, 0 }
  0x6b   : > { %v3264_v46 = vcombine.low %v2009_v9, %v2012_v20  ;;  %v1939_v9 = vld [vmem:[%s4207_s27 + $0x30] sm:$0xc]  ;;  %v3265_v20 = vcombine.low %v2016_v37, %v2019_v34  ;;  %v2031_v25 = vrot.slane %v2029_v17, 4  ;;  %v2038_v11 = vrot.slane %v2036_v38, 4  ;;  %v1941_v37 = vld [vmem:[%s4207_s27 + $0x3c] sm:$0xc] }
  0x6c   : > { %v2043_v7 = vrot.slane %v4273_v41, 6  ;;  %v1942_v34 = vld [vmem:[%s4207_s27 + $0x44] sm:$0x3]  ;;  %v3252_v41 = vrot.slane %v1941_v37, 10 }
  0x6e   : > { %3544 = vmatmul.mubr.msk.bf16.gmra.mrb[12].mxu1 %vm346_vm3, %v4300_v54  ;;  %3692 = vmatmul.mubr.msk.bf16.gmra.mrb[24].mxu0 %vm346_vm3, %v4595_v14  ;;  %v1935_v14 = vld [vmem:[%s4207_s27 + $0x18] sm:$0xc] }
  0x6f   : > { %3547 = vmatprep.mubr.msk.bf16.mxu1 %vm346_vm3, %v4320_v3  ;;  %3695 = vmatprep.mubr.msk.bf16.mxu0 %vm346_vm3, %v3229_v22  ;;  %v1936_v22 = vld [vmem:[%s4207_s27 + $0x20] sm:$0x3]  ;;  %v3249_v12 = vrot.slane %v1935_v14, 10 }
  0x70   : > { %v2025_v40 = vrot.slane %v1936_v22, 6  ;;  %v2032_v22 = vrot.slane %v1938_v13, 6 }
  0x71   : > { %v2023_v14 = vsel %vm4601_vm6, %v3249_v12, %v2022_v0  ;;  %v3251_v0 = vrot.slane %v1939_v9, 10  ;;  %v2046_v9 = vrot.slane %v1942_v34, 6 }
  0x72   : > { %v2026_v1 = vsel %vm4601_vm6, %v2024_v39, %v2025_v40  ;;  %v2033_v48 = vsel %vm4601_vm6, %v2031_v25, %v2032_v22  ;;  %v2057_v22 = vrot.slane %v4313_v63, 6 }
  0x73   : > { %v4646_v24 = vcombine.low %v2023_v14, %v2026_v1  ;;  %v2037_v39 = vsel %vm4601_vm6, %v3251_v0, %v2036_v38  ;;  %v2050_v14 = vrot.slane %v4303_v55, 6  ;;  %v1943_v1 = vld [vmem:[%s4207_s27 + $0x48] sm:$0xc]  ;;  %v2045_v38 = vrot.slane %v2043_v7, 4 }
  0x74   : > { %v2044_v55 = vsel %vm4601_vm6, %v3252_v41, %v2043_v7  ;;  %v2059_v63 = vrot.slane %v2057_v22, 4 }
  0x75   : > { %v2047_v25 = vsel %vm4601_vm6, %v2045_v38, %v2046_v9  ;;  %v2071_v38 = vrot.slane %v4341_v26, 6 }
  0x76   : > { %3548 = vmatmul.mubr.msk.bf16.gmra.mrb[16].mxu1 %vm346_vm3, %v4355_v31  ;;  %3696 = vmatmul.mubr.msk.bf16.gmra.mrb[28].mxu0 %vm346_vm3, %v3230_v53  ;;  %v1937_v53 = vld [vmem:[%s4207_s27 + $0x24] sm:$0xc] }
  0x77   : > { %3551 = vmatprep.mubr.msk.bf16.mxu1 %vm346_vm3, %v4366_v45  ;;  %3701 = vmatprep.mubr.msk.bf16.mxu0 %vm346_vm3, %v3264_v46  ;;  %v1940_v46 = vld [vmem:[%s4207_s27 + $0x38] sm:$0x3]  ;;  %v3250_v27 = vrot.slane %v1937_v53, 10 }
  0x78   : > { %v2039_v40 = vrot.slane %v1940_v46, 6  ;;  %v3253_v46 = vrot.slane %v1943_v1, 10 }
  0x79   : > { %v2030_v61 = vsel %vm4601_vm6, %v3250_v27, %v2029_v17  ;;  %v1944_v17 = vld [vmem:[%s4207_s27 + $0x50] sm:$0x3] }
  0x7a   : > { %v2040_v12 = vsel %vm4601_vm6, %v2038_v11, %v2039_v40  ;;  %v4678_v53 = vcombine.low %v2030_v61, %v2033_v48  ;;  %v2053_v27 = vrot.slane %v1944_v17, 6  ;;  %v1945_v11 = vld [vmem:[%s4207_s27 + $0x54] sm:$0xc]  ;;  %v1946_v40 = vld [vmem:[%s4207_s27 + $0x5c] sm:$0x3]  ;;  %v2064_v61 = vrot.slane %v4332_v19, 6 }
  0x7b   : > { %v4680_v13 = vcombine.low %v2037_v39, %v2040_v12  ;;  %v1947_v48 = vld [vmem:[%s4207_s27 + $0x60] sm:$0xc]  ;;  %v1948_v39 = vld [vmem:[%s4207_s27 + $0x68] sm:$0x3]  ;;  %v4704_v12 = vcombine.low %v2044_v55, %v2047_v25  ;;  %v3254_v37 = vrot.slane %v1945_v11, 10  ;;  %v2060_v34 = vrot.slane %v1946_v40, 6 }
  0x7c   : > { %v2066_v1 = vrot.slane %v2064_v61, 4  ;;  %v2067_v17 = vrot.slane %v1948_v39, 6  ;;  %v1951_v55 = vld [vmem:[%s4207_s27 + $0x78] sm:$0xc]  ;;  %v1952_v25 = vld [vmem:[%s4207_s27 + $0x80] sm:$0x3] }
  0x7d   : > { %v2058_v19 = vsel %vm4601_vm6, %v3254_v37, %v2057_v22  ;;  %v2061_v41 = vsel %vm4601_vm6, %v2059_v63, %v2060_v34  ;;  %v1276_v22 = vsel %vm395_vm0, %v4507_v8, 0  ;;  %v2073_v11 = vrot.slane %v2071_v38, 4  ;;  %v1953_v34 = vld [vmem:[%s4207_s27 + $0x84] sm:$0xc] }
  0x7e   : > { %3552 = vmatmul.mubr.msk.bf16.gmra.mrb[20].mxu1 %vm346_vm3, %v4383_v51  ;;  %3702 = vmatmul.mubr.msk.bf16.vlgmr.msra.gmra.mrb[0].mxu0 %vm346_vm3, %v3265_v20  ;;  %v2052_v20 = vrot.slane %v2050_v14, 4  ;;  %v2081_v39 = vrot.slane %v1952_v25, 6  ;;  %v2085_v37 = vrot.slane %v4434_v15, 6  ;;  %v3258_v15 = vrot.slane %v1953_v34, 10  ;;  %v1957_v25 = vld [vmem:[%s4207_s27 + $0x9c] sm:$0xc] }
  0x7f   : > { %3555 = vmatprep.mubr.msk.bf16.mxu1 %vm346_vm3, %v4386_v52  ;;  %3734 = vmatpush3.bf16.msra.mxu0 %v2445_v18  ;;  %v2051_v18 = vsel %vm4601_vm6, %v3253_v46, %v2050_v14  ;;  %v3255_v14 = vrot.slane %v1947_v48, 10  ;;  %v2068_v46 = vsel %vm4601_vm6, %v2066_v1, %v2067_v17  ;;  %v2092_v1 = vrot.slane %v4439_v16, 6  ;;  %v1955_v17 = vld [vmem:[%s4207_s27 + $0x90] sm:$0xc] }
  0x80   : > { %3705 = vmatprep.mubr.msk.bf16.mxu0 %vm346_vm3, %v4646_v24  ;;  %4068 = vmatprep.subr.msk.bf16.mxu0 %vm395_vm0, %v4655_v33  ;;  %v2054_v0 = vsel %vm4601_vm6, %v2052_v20, %v2053_v27  ;;  %v1949_v20 = vld [vmem:[%s4207_s27 + $0x6c] sm:$0xc]  ;;  %v1950_v27 = vld [vmem:[%s4207_s27 + $0x74] sm:$0x3] }
  0x81   : > { %v4706_v7 = vcombine.low %v2051_v18, %v2054_v0  ;;  %v2065_v9 = vsel %vm4601_vm6, %v3255_v14, %v2064_v61  ;;  %v4730_v18 = vcombine.low %v2058_v19, %v2061_v41  ;;  %v3256_v26 = vrot.slane %v1949_v20, 10  ;;  %v1954_v14 = vld [vmem:[%s4207_s27 + $0x8c] sm:$0x3]  ;;  %v1956_v19 = vld [vmem:[%s4207_s27 + $0x98] sm:$0x3] }
  0x82   : > { %v4734_v0 = vcombine.low %v2065_v9, %v2068_v46  ;;  %v2074_v40 = vrot.slane %v1950_v27, 6  ;;  %v3257_v61 = vrot.slane %v1951_v55, 10  ;;  %v2088_v9 = vrot.slane %v1954_v14, 6  ;;  %v1961_v14 = vld [vmem:[%s4207_s27 + $0xb4] sm:$0xc] }
  0x83   : > { %v3259_v46 = vrot.slane %v1955_v17, 10  ;;  %v2094_v20 = vrot.slane %v2092_v1, 4  ;;  %v2095_v27 = vrot.slane %v1956_v19, 6  ;;  %v3262_v19 = vrot.slane %v1961_v14, 10  ;;  %v5133_v14 = vld [vmem:[#allocation7_spill] sm:$0xff] }
  0x84   : > { %v2075_v8 = vsel %vm4601_vm6, %v2073_v11, %v2074_v40  ;;  %v1960_v11 = vld [vmem:[%s4207_s27 + $0xb0] sm:$0x3] }
  0x85   : > { %v2096_v55 = vsel %vm4601_vm6, %v2094_v20, %v2095_v27  ;;  %v957_v27 = vld [vmem:[%s4207_s27 + $0xc] sm:$0xe] }
  0x86   : > { %3556 = vmatmul.mubr.msk.bf16.gmra.mrb[24].mxu1 %vm346_vm3, %v4399_v56  ;;  %3706 = vmatmul.mubr.msk.bf16.gmra.mrb[4].mxu0 %vm346_vm3, %v4678_v53 }
  0x87   : > { %3559 = vmatprep.mubr.msk.bf16.mxu1 %vm346_vm3, %v4402_v57  ;;  %3709 = vmatprep.mubr.msk.bf16.mxu0 %vm346_vm3, %v4680_v13 }
  0x8e   : > { %3560 = vmatmul.mubr.msk.bf16.gmra.mrb[28].mxu1 %vm346_vm3, %v4426_v62  ;;  %3710 = vmatmul.mubr.msk.bf16.gmra.mrb[8].mxu0 %vm346_vm3, %v4704_v12 }
  0x8f   : > { %3565 = vmatprep.mubr.msk.bf16.mxu1 %vm346_vm3, %v4241_v21  ;;  %3713 = vmatprep.mubr.msk.bf16.mxu0 %vm346_vm3, %v4706_v7  ;;  %v2078_v21 = vrot.slane %v4409_v60, 6  ;;  %v2072_v60 = vsel %vm4601_vm6, %v3256_v26, %v2071_v38  ;;  %v2087_v38 = vrot.slane %v2085_v37, 4  ;;  %v1959_v26 = vld [vmem:[%s4207_s27 + $0xa8] sm:$0xc] }
  0x90   : > { %v4760_v41 = vcombine.low %v2072_v60, %v2075_v8  ;;  %v3261_v60 = vrot.slane %v1959_v26, 10  ;;  %v3296_v26 = vrot.slane %v1963_v6, 10 }
  0x91   : > { %v2080_v48 = vrot.slane %v2078_v21, 4  ;;  %v2089_v16 = vsel %vm4601_vm6, %v2087_v38, %v2088_v9 }
  0x93   : > { %v2082_v63 = vsel %vm4601_vm6, %v2080_v48, %v2081_v39  ;;  %v3260_v48 = vrot.slane %v1957_v25, 10 }
  0x96   : > { %3566 = vmatmul.mubr.msk.bf16.vlgmr.msra.gmra.mrb[0].mxu1 %vm346_vm3, %v4256_v30  ;;  %3714 = vmatmul.mubr.msk.bf16.gmra.mrb[12].mxu0 %vm346_vm3, %v4730_v18  ;;  %v2079_v30 = vsel %vm4601_vm6, %v3257_v61, %v2078_v21  ;;  %v2099_v21 = vrot.slane %v4464_v50, 6 }
  0x97   : > { %3598 = vmatpush3.bf16.msra.mxu1 %v1276_v22  ;;  %3717 = vmatprep.mubr.msk.bf16.mxu0 %vm346_vm3, %v4734_v0  ;;  %v1958_v22 = vld [vmem:[%s4207_s27 + $0xa4] sm:$0x3] }
  0x98   : > { %3569 = vmatprep.mubr.msk.bf16.mxu1 %vm346_vm3, %v4266_v36  ;;  %4064 = vmatprep.subr.msk.bf16.mxu1 %vm395_vm0, %v4184_v2  ;;  %v4762_v36 = vcombine.low %v2079_v30, %v2082_v63  ;;  %v2086_v2 = vsel %vm4601_vm6, %v3258_v15, %v2085_v37  ;;  %v2101_v50 = vrot.slane %v2099_v21, 4  ;;  %v2102_v39 = vrot.slane %v1958_v22, 6 }
  0x99   : > { %v4786_v40 = vcombine.low %v2086_v2, %v2089_v16  ;;  %v2109_v37 = vrot.slane %v1960_v11, 6  ;;  %v2113_v63 = vrot.slane %v4498_v49, 6  ;;  %v959_v2 = vld [vmem:[%s4207_s27 + $0x14] sm:$0x1]  ;;  %v4113_v16 = vld [vmem:[%s4207_s27 + $0xe4] sm:$0xff]  }
  0x9a   : > { %v2103_v30 = vsel %vm4601_vm6, %v2101_v50, %v2102_v39  ;;  %v1966_v50 = vld [vmem:[%s4207_s27 + $0xd4] sm:$0x3] }
  0x9b   : > { %v2115_v15 = vrot.slane %v2113_v63, 4  ;;  %v2114_v49 = vsel %vm4601_vm6, %v3262_v19, %v2113_v63  ;;  %v5130_v63 = vld [vmem:[#allocation4_spill] sm:$0xff]  ;;  %v5135_v19 = vld [vmem:[#allocation9_spill] sm:$0xff] }
  0x9e   : > { %3570 = vmatmul.mubr.msk.bf16.gmra.mrb[4].mxu1 %vm346_vm3, %v4300_v54  ;;  %3718 = vmatmul.mubr.msk.bf16.gmra.mrb[16].mxu0 %vm346_vm3, %v4760_v41  ;;  %v2093_v54 = vsel %vm4601_vm6, %v3259_v46, %v2092_v1  ;;  %v1962_v1 = vld [vmem:[%s4207_s27 + $0xbc] sm:$0x3] }
  0x9f   : > { %3573 = vmatprep.mubr.msk.bf16.mxu1 %vm346_vm3, %v4320_v3  ;;  %3721 = vmatprep.mubr.msk.bf16.mxu0 %vm346_vm3, %v4762_v36  ;;  %v2106_v3 = vrot.slane %v4469_v59, 6  ;;  %v4788_v61 = vcombine.low %v2093_v54, %v2096_v55  ;;  %v2100_v59 = vsel %vm4601_vm6, %v3260_v48, %v2099_v21  ;;  %v2116_v38 = vrot.slane %v1962_v1, 6  ;;  %v1965_v48 = vld [vmem:[%s4207_s27 + $0xcc] sm:$0xc]  ;;  %v5134_v1 = vld [vmem:[#allocation8_spill] sm:$0xff] }
  0xa0   : > { %v3157_v21 = vrot.slane %v957_v27, 9  ;;  %v1077_v55 = vrot.slane %v959_v2, 5  ;;  %v3297_v39 = vrot.slane %v1965_v48, 10 }
  0xa1   : > { %v2108_v8 = vrot.slane %v2106_v3, 4  ;;  %v2117_v9 = vsel %vm4601_vm6, %v2115_v15, %v2116_v38 }
  0xa2   : > { %v4825_v46 = vcombine.low %v2114_v49, %v2117_v9  ;;  %v1969_v49 = vld [vmem:[%s4207_s27 + $0xe4] sm:$0xc]  ;;  %v1970_v9 = vld [vmem:[%s4207_s27 + $0xec] sm:$0x3] }
  0xa3   : > { %v2110_v34 = vsel %vm4601_vm6, %v2108_v8, %v2109_v37  ;;  %v2428_v8 = vrot.slane %v1966_v50, 6  ;;  %v5128_v37 = vld [vmem:[#allocation2_spill] sm:$0xff] }
  0xa6   : > { %3574 = vmatmul.mubr.msk.bf16.gmra.mrb[8].mxu1 %vm346_vm3, %v4355_v31  ;;  %3722 = vmatmul.mubr.msk.bf16.gmra.mrb[20].mxu0 %vm346_vm3, %v4786_v40  ;;  %v2107_v31 = vsel %vm4601_vm6, %v3261_v60, %v2106_v3  ;;  %v1964_v3 = vld [vmem:[%s4207_s27 + $0xc8] sm:$0x3] }
  0xa7   : > { %3577 = vmatprep.mubr.msk.bf16.mxu1 %vm346_vm3, %v4366_v45  ;;  %3725 = vmatprep.mubr.msk.bf16.mxu0 %vm346_vm3, %v4788_v61  ;;  %v4809_v45 = vcombine.low %v2100_v59, %v2103_v30  ;;  %v4811_v17 = vcombine.low %v2107_v31, %v2110_v34  ;;  %v2421_v11 = vrot.slane %v1964_v3, 6  ;;  %v5131_v31 = vld [vmem:[#allocation5_spill] sm:$0xff]  ;;  %v5132_v34 = vld [vmem:[#allocation6_spill] sm:$0xff] }
  0xa8   : > { %v5003_v3 = vld [vmem:[%s5090_s2] ss:$0 sm:$0xff] }
  0xae   : > { %3578 = vmatmul.mubr.msk.bf16.gmra.mrb[12].mxu1 %vm346_vm3, %v4383_v51  ;;  %3726 = vmatmul.mubr.msk.bf16.gmra.mrb[24].mxu0 %vm346_vm3, %v4809_v45  ;;  %v2673_v51 = vsel %vm395_vm0, %v4655_v33, 0 }
  0xaf   : > { %3581 = vmatprep.mubr.msk.bf16.mxu1 %vm346_vm3, %v4386_v52  ;;  %3729 = vmatprep.mubr.msk.bf16.mxu0 %vm346_vm3, %v4811_v17  ;;  %v1067_v52 = vrot.slane %v4573_v29, 5 }
  0xb6   : > { %3582 = vmatmul.mubr.msk.bf16.gmra.mrb[16].mxu1 %vm346_vm3, %v4399_v56  ;;  %3730 = vmatmul.mubr.msk.bf16.gmra.mrb[28].mxu0 %vm346_vm3, %v4825_v46  ;;  %v954_v56 = vld [vmem:[%s4207_s27] sm:$0xe] }
  0xb7   : > { %3585 = vmatprep.mubr.msk.bf16.mxu1 %vm346_vm3, %v4402_v57  ;;  %3735 = vmatprep.mubr.msk.bf16.mxu0 %vm346_vm3, %v4646_v24  ;;  %v956_v57 = vld [vmem:[%s4207_s27 + $0x8] sm:$0x1]  ;;  %v4112_v24 = vld [vmem:[%s4207_s27 + $0xd8] sm:$0xff]   ;;  %v3156_v33 = vrot.slane %v954_v56, 9 }
  0xb8   : > { %v1070_v20 = vrot.slane %v956_v57, 5  ;;  %v2656_v57 = vrot.slane %v1970_v9, 6 }
  0xb9   : > { %v1068_v29 = vsel %vm4209_vm4, %v3156_v33, %v1067_v52 }
  0xbe   : > { %3586 = vmatmul.mubr.msk.bf16.gmra.mrb[20].mxu1 %vm346_vm3, %v4426_v62  ;;  %3736 = vmatmul.mubr.msk.bf16.vlgmr.msra.gmra.mrb[0].mxu0 %vm346_vm3, %v4678_v53  ;;  %v1069_v62 = vrot.slane %v1067_v52, 4  ;;  %v3318_v52 = vrot.slane %v1969_v49, 10 }
  0xbf   : > { %3589 = vmatprep.mubr.msk.bf16.mxu1 %vm346_vm3, %v4431_v10  ;;  %3768 = vmatpush3.bf16.msra.mxu0 %v2673_v51  ;;  %v1074_v10 = vrot.slane %v4598_v44, 5 }
  0xc0   : > { %3739 = vmatprep.mubr.msk.bf16.mxu0 %vm346_vm3, %v4680_v13  ;;  %v1071_v53 = vsel %vm4209_vm4, %v1069_v62, %v1070_v20 }
  0xc1   : > { %v1076_v54 = vrot.slane %v1074_v10, 4  ;;  %v1075_v44 = vsel %vm4209_vm4, %v3157_v21, %v1074_v10 }
  0xc3   : > { %v1078_v25 = vsel %vm4209_vm4, %v1076_v54, %v1077_v55 }
  0xc4   : > { %v3174_v22 = vcombine.low %v1075_v44, %v1078_v25 }
  0xc6   : > { %3590 = vmatmul.mubr.msk.bf16.gmra.mrb[24].mxu1 %vm346_vm3, %v4456_v28  ;;  %3740 = vmatmul.mubr.msk.bf16.gmra.mrb[4].mxu0 %vm346_vm3, %v4704_v12  ;;  %v3173_v28 = vcombine.low %v1068_v29, %v1071_v53 }
  0xc7   : > { %3593 = vmatprep.mubr.msk.bf16.mxu1 %vm346_vm3, %v4112_v24  ;;  %3743 = vmatprep.mubr.msk.bf16.mxu0 %vm346_vm3, %v4706_v7 }
  0xce   : > { %3594 = vmatmul.mubr.msk.bf16.gmra.mrb[28].mxu1 %vm346_vm3, %v4113_v16  ;;  %3744 = vmatmul.mubr.msk.bf16.gmra.mrb[8].mxu0 %vm346_vm3, %v4730_v18 }
  0xcf   : > { %3599 = vmatprep.mubr.msk.bf16.mxu1 %vm346_vm3, %v3173_v28  ;;  %3747 = vmatprep.mubr.msk.bf16.mxu0 %vm346_vm3, %v4734_v0 }
  0xd6   : > { %3600 = vmatmul.mubr.msk.bf16.vlgmr.msra.gmra.mrb[0].mxu1 %vm346_vm3, %v3174_v22  ;;  %3748 = vmatmul.mubr.msk.bf16.gmra.mrb[12].mxu0 %vm346_vm3, %v4760_v41 }
  0xd7   : > { %3802 = vmatpush3.bf16.msra.mxu1 %v4195_v4  ;;  %3751 = vmatprep.mubr.msk.bf16.mxu0 %vm346_vm3, %v4762_v36  ;;  %v2418_v4 = vrot.slane %v4502_v42, 6 }
  0xd8   : > { %3603 = vmatprep.mubr.msk.bf16.mxu1 %vm346_vm3, %v4259_v32 }
  0xd9   : > { %v2420_v32 = vrot.slane %v2418_v4, 4 }
  0xdb   : > { %v2422_v42 = vsel %vm4601_vm6, %v2420_v32, %v2421_v11 }
  0xde   : > { %3604 = vmatmul.mubr.msk.bf16.gmra.mrb[4].mxu1 %vm346_vm3, %v4282_v43  ;;  %3752 = vmatmul.mubr.msk.bf16.gmra.mrb[16].mxu0 %vm346_vm3, %v4786_v40  ;;  %v2425_v43 = vrot.slane %v4536_v35, 6 }
  0xdf   : > { %3607 = vmatprep.mubr.msk.bf16.mxu1 %vm346_vm3, %v4306_v58  ;;  %3755 = vmatprep.mubr.msk.bf16.mxu0 %vm346_vm3, %v4788_v61  ;;  %v2419_v58 = vsel %vm4601_vm6, %v3296_v26, %v2418_v4 }
  0xe0   : > { %v2427_v60 = vrot.slane %v2425_v43, 4  ;;  %v2426_v35 = vsel %vm4601_vm6, %v3297_v39, %v2425_v43 }
  0xe2   : > { %v2429_v59 = vsel %vm4601_vm6, %v2427_v60, %v2428_v8 }
  0xe3   : > { %v3300_v30 = vcombine.low %v2426_v35, %v2429_v59 }
  0xe6   : > { %3608 = vmatmul.mubr.msk.bf16.gmra.mrb[8].mxu1 %vm346_vm3, %v4324_v5  ;;  %3756 = vmatmul.mubr.msk.bf16.gmra.mrb[20].mxu0 %vm346_vm3, %v4809_v45  ;;  %v3299_v5 = vcombine.low %v2419_v58, %v2422_v42 }
  0xe7   : > { %3611 = vmatprep.mubr.msk.bf16.mxu1 %vm346_vm3, %v4337_v23  ;;  %3759 = vmatprep.mubr.msk.bf16.mxu0 %vm346_vm3, %v4811_v17  ;;  %v5129_v23 = vld [vmem:[#allocation3_spill] sm:$0xff] }
  0xee   : > { %3612 = vmatmul.mubr.msk.bf16.gmra.mrb[12].mxu1 %vm346_vm3, %v5128_v37  ;;  %3760 = vmatmul.mubr.msk.bf16.gmra.mrb[24].mxu0 %vm346_vm3, %v4825_v46 }
  0xef   : > { %3615 = vmatprep.mubr.msk.bf16.mxu1 %vm346_vm3, %v5129_v23  ;;  %3763 = vmatprep.mubr.msk.bf16.mxu0 %vm346_vm3, %v3299_v5 }
  0xf6   : > { %3616 = vmatmul.mubr.msk.bf16.gmra.mrb[16].mxu1 %vm346_vm3, %v5130_v63  ;;  %3764 = vmatmul.mubr.msk.bf16.gmra.mrb[28].mxu0 %vm346_vm3, %v3300_v30 }
  0xf7   : > { %3619 = vmatprep.mubr.msk.bf16.mxu1 %vm346_vm3, %v5131_v31  ;;  %3769 = vmatprep.mubr.msk.bf16.mxu0 %vm346_vm3, %v4680_v13  ;;  %v5136_v13 = vld [vmem:[#allocation11_spill] sm:$0xff] }
  0xfe   : > { %3620 = vmatmul.mubr.msk.bf16.gmra.mrb[20].mxu1 %vm346_vm3, %v5132_v34  ;;  %3770 = vmatmul.mubr.msk.bf16.vlgmr.msra.gmra.mrb[0].mxu0 %vm346_vm3, %v4704_v12  ;;  %v5137_v12 = vld [vmem:[#allocation10_spill] sm:$0xff] }
  0xff   : > { %3623 = vmatprep.mubr.msk.bf16.mxu1 %vm346_vm3, %v5133_v14  ;;  %3773 = vmatprep.mubr.msk.bf16.mxu0 %vm346_vm3, %v4706_v7  ;;  %v2646_v7 = vrot.slane %v5137_v12, 6 }
 0x106   : > { %3624 = vmatmul.mubr.msk.bf16.gmra.mrb[24].mxu1 %vm346_vm3, %v5134_v1  ;;  %3774 = vmatmul.mubr.msk.bf16.gmra.mrb[4].mxu0 %vm346_vm3, %v4730_v18  ;;  %v1967_v18 = vld [vmem:[%s4207_s27 + $0xd8] sm:$0xc] }
 0x107   : > { %3627 = vmatprep.mubr.msk.bf16.mxu1 %vm346_vm3, %v5135_v19  ;;  %3777 = vmatprep.mubr.msk.bf16.mxu0 %vm346_vm3, %v4734_v0  ;;  %v1968_v0 = vld [vmem:[%s4207_s27 + $0xe0] sm:$0x3] }
 0x10e   : > { %3628 = vmatmul.mubr.msk.bf16.gmra.mrb[28].mxu1 %vm346_vm3, %v5136_v13  ;;  %3778 = vmatmul.mubr.msk.bf16.gmra.mrb[8].mxu0 %vm346_vm3, %v4760_v41  ;;  %v3317_v41 = vrot.slane %v1967_v18, 10 }
 0x10f   : > { %3649 = vmatprep.mubr.msk.bf16.mxu1 %vm346_vm3, %v5131_v31  ;;  %3781 = vmatprep.mubr.msk.bf16.mxu0 %vm346_vm3, %v4762_v36  ;;  %v2648_v36 = vrot.slane %v2646_v7, 4 }
 0x110   : > { %v2647_v15 = vsel %vm4601_vm6, %v3317_v41, %v2646_v7 }
 0x116   : > { %3650 = vmatmul.mubr.msk.bf16.vlgmr.msra.gmra.mrb[16].mxu1 %vm346_vm3, %v5132_v34  ;;  %3782 = vmatmul.mubr.msk.bf16.gmra.mrb[12].mxu0 %vm346_vm3, %v4786_v40  ;;  %v2649_v40 = vrot.slane %v1968_v0, 6 }
 0x117   : > { %3653 = vmatprep.mubr.msk.bf16.mxu1 %vm346_vm3, %v5133_v14  ;;  %3785 = vmatprep.mubr.msk.bf16.mxu0 %vm346_vm3, %v4788_v61  ;;  %v5138_v61 = vld [vmem:[#allocation12_spill] sm:$0xff] }
 0x118   : > { %v2650_v38 = vsel %vm4601_vm6, %v2648_v36, %v2649_v40 }
 0x119   : > { %v3320_v51 = vcombine.low %v2647_v15, %v2650_v38 }
 0x11e   : > { %3654 = vmatmul.mubr.msk.bf16.gmra.mrb[20].mxu1 %vm346_vm3, %v5134_v1  ;;  %3786 = vmatmul.mubr.msk.bf16.gmra.mrb[16].mxu0 %vm346_vm3, %v4809_v45  ;;  %v5139_v45 = vld [vmem:[#allocation13_spill] sm:$0xff] }
 0x11f   : > { %3657 = vmatprep.mubr.msk.bf16.mxu1 %vm346_vm3, %v5135_v19  ;;  %3789 = vmatprep.mubr.msk.bf16.mxu0 %vm346_vm3, %v4811_v17  ;;  %v2653_v17 = vrot.slane %v5139_v45, 6 }
 0x121   : > { %v2655_v56 = vrot.slane %v2653_v17, 4  ;;  %v2654_v24 = vsel %vm4601_vm6, %v3318_v52, %v2653_v17 }
 0x123   : > { %v2657_v33 = vsel %vm4601_vm6, %v2655_v56, %v2656_v57 }
 0x124   : > { %v3321_v62 = vcombine.low %v2654_v24, %v2657_v33 }
 0x126   : > { %3658 = vmatmul.mubr.msk.bf16.gmra.mrb[24].mxu1 %vm346_vm3, %v5136_v13  ;;  %3790 = vmatmul.mubr.msk.bf16.gmra.mrb[20].mxu0 %vm346_vm3, %v4825_v46  ;;  %v5140_v46 = vld [vmem:[#allocation14_spill] sm:$0xff] }
 0x127   : > { %3661 = vmatprep.mubr.msk.bf16.mxu1 %vm346_vm3, %v5138_v61  ;;  %3793 = vmatprep.mubr.msk.bf16.mxu0 %vm346_vm3, %v3299_v5 }
 0x12e   : > { %3662 = vmatmul.mubr.msk.bf16.gmra.mrb[28].mxu1 %vm346_vm3, %v5140_v46  ;;  %3794 = vmatmul.mubr.msk.bf16.gmra.mrb[24].mxu0 %vm346_vm3, %v3300_v30 }
 0x12f   : > { %3797 = vmatprep.mubr.msk.bf16.mxu0 %vm346_vm3, %v3320_v51 }
 0x136   : > { %3798 = vmatmul.mubr.msk.bf16.gmra.mrb[28].mxu0 %vm346_vm3, %v3321_v62 }
 0x1a9   : > { %v3601_v20 = vpop.f32.mrb[0].mxu1 }
 0x1aa   : > { %v1312_v10 = vpop.f32.mrb[1].mxu1 }
 0x1ab   : > { %v3602_v29 = vpop.f32.mrb[2].mxu1 }
 0x1ac   : > { %v1315_v53 = vpop.f32.mrb[3].mxu1 }
 0x1b1   : > { %v3605_v27 = vpop.f32.mrb[4].mxu1 }
 0x1b2   : > { %v1328_v2 = vpop.f32.mrb[5].mxu1 }
 0x1b3   : > { %v3606_v16 = vpop.f32.mrb[6].mxu1 }
 0x1b4   : > { %v1331_v28 = vpop.f32.mrb[7].mxu1 }
 0x1b9   : > { %v3609_v21 = vpop.f32.mrb[8].mxu1 }
 0x1ba   : > { %v1344_v54 = vpop.f32.mrb[9].mxu1 }
 0x1bb   : > { %v3610_v55 = vpop.f32.mrb[10].mxu1 }
 0x1bc   : > { %v1347_v44 = vpop.f32.mrb[11].mxu1 }
 0x1c1   : > { %v4992_v25 = vpop.f32.mrb[12].mxu1 }
 0x1c2   : > { %v4994_v47 = vpop.f32.mrb[13].mxu1 }
 0x1c3   : > { %v4996_v22 = vpop.f32.mrb[14].mxu1 }
 0x1c4   : > { %v4998_v4 = vpop.f32.mrb[15].mxu1 }
 0x1d1   : > { %v3771_v6 = vpop.f32.mrb[0].mxu0 }
 0x1d2   : > { %v3803_v26 = vadd.f32 %v3771_v6, %v3601_v20  ;;  %v2709_v32 = vpop.f32.mrb[1].mxu0 }
 0x1d3   : > { %v3804_v11 = vadd.f32 %v2709_v32, %v1312_v10  ;;  %v3772_v43 = vpop.f32.mrb[2].mxu0 }
 0x1d4   : > { %v2877_v58 = vadd.f32 %v3803_v26, %v5003_v3  ;;  %v3805_v42 = vadd.f32 %v3772_v43, %v3602_v29  ;;  %v2712_v48 = vpop.f32.mrb[3].mxu0 }
 0x1d5   : > { %v2875_v50 = vadd.f32 %v3804_v11, %v5003_v3  ;;  %v3806_v5 = vadd.f32 %v2712_v48, %v1315_v53 }
 0x1d6   : > { %v2909_v39 = vmax.f32 %v2877_v58, 0.0  ;;  %v2878_v60 = vadd.f32 %v3805_v42, %v5003_v3 }
 0x1d7   : > { %v2907_v8 = vmax.f32 %v2875_v50, 0.0  ;;  %v2876_v37 = vadd.f32 %v3806_v5, %v5003_v3 }
 0x1d8   : > { %2941 = vst [vmem:[%s5010_s20 + $0x10] sm:$0xff] %v2909_v39  ;;  %v2910_v23 = vmax.f32 %v2878_v60, 0.0 }
 0x1d9   : > { %2939 = vst [vmem:[%s5010_s20] sm:$0xff] %v2907_v8  ;;  %v2908_v35 = vmax.f32 %v2876_v37, 0.0  ;;  %v3775_v59 = vpop.f32.mrb[4].mxu0 }
 0x1da   : > { %2942 = vst [vmem:[%s5010_s20 + $0x18] sm:$0xff] %v2910_v23  ;;  %v3807_v30 = vadd.f32 %v3775_v59, %v3605_v27  ;;  %v2725_v63 = vpop.f32.mrb[5].mxu0 }
 0x1db   : > { %2940 = vst [vmem:[%s5010_s20 + $0x8] sm:$0xff] %v2908_v35  ;;  %v3808_v31 = vadd.f32 %v2725_v63, %v1328_v2  ;;  %v3776_v34 = vpop.f32.mrb[6].mxu0 }
 0x1dc   : > { %v2881_v14 = vadd.f32 %v3807_v30, %v5003_v3  ;;  %v3809_v1 = vadd.f32 %v3776_v34, %v3606_v16  ;;  %v2728_v19 = vpop.f32.mrb[7].mxu0 }
 0x1dd   : > { %v2879_v13 = vadd.f32 %v3808_v31, %v5003_v3  ;;  %v3810_v12 = vadd.f32 %v2728_v19, %v1331_v28 }
 0x1de   : > { %v2913_v7 = vmax.f32 %v2881_v14, 0.0  ;;  %v2882_v18 = vadd.f32 %v3809_v1, %v5003_v3 }
 0x1df   : > { %v2911_v0 = vmax.f32 %v2879_v13, 0.0  ;;  %v2880_v41 = vadd.f32 %v3810_v12, %v5003_v3 }
 0x1e0   : > { %2945 = vst [vmem:[%s5010_s20 + $0x30] sm:$0xff] %v2913_v7  ;;  %v2914_v36 = vmax.f32 %v2882_v18, 0.0 }
 0x1e1   : > { %2943 = vst [vmem:[%s5010_s20 + $0x20] sm:$0xff] %v2911_v0  ;;  %v2912_v40 = vmax.f32 %v2880_v41, 0.0  ;;  %v3779_v61 = vpop.f32.mrb[8].mxu0 }
 0x1e2   : > { %2946 = vst [vmem:[%s5010_s20 + $0x38] sm:$0xff] %v2914_v36  ;;  %v3811_v45 = vadd.f32 %v3779_v61, %v3609_v21  ;;  %v2741_v17 = vpop.f32.mrb[9].mxu0 }
 0x1e3   : > { %2944 = vst [vmem:[%s5010_s20 + $0x28] sm:$0xff] %v2912_v40  ;;  %v3812_v15 = vadd.f32 %v2741_v17, %v1344_v54  ;;  %v3780_v38 = vpop.f32.mrb[10].mxu0 }
 0x1e4   : > { %v2885_v49 = vadd.f32 %v3811_v45, %v5003_v3  ;;  %v3813_v9 = vadd.f32 %v3780_v38, %v3610_v55  ;;  %v2744_v51 = vpop.f32.mrb[11].mxu0 }
 0x1e5   : > { %v2883_v52 = vadd.f32 %v3812_v15, %v5003_v3  ;;  %v3814_v56 = vadd.f32 %v2744_v51, %v1347_v44 }
 0x1e6   : > { %v2917_v57 = vmax.f32 %v2885_v49, 0.0  ;;  %v2886_v46 = vadd.f32 %v3813_v9, %v5003_v3 }
 0x1e7   : > { %v2915_v24 = vmax.f32 %v2883_v52, 0.0  ;;  %v2884_v33 = vadd.f32 %v3814_v56, %v5003_v3 }
 0x1e8   : > { %2949 = vst [vmem:[%s5010_s20 + $0x50] sm:$0xff] %v2917_v57  ;;  %v2918_v62 = vmax.f32 %v2886_v46, 0.0 }
 0x1e9   : > { %v3651_v20 = vpop.f32.mrb[16].mxu1  ;;  %2947 = vst [vmem:[%s5010_s20 + $0x40] sm:$0xff] %v2915_v24  ;;  %v2916_v10 = vmax.f32 %v2884_v33, 0.0  ;;  %v3783_v29 = vpop.f32.mrb[12].mxu0 }
 0x1ea   : > { %v1606_v53 = vpop.f32.mrb[17].mxu1  ;;  %2950 = vst [vmem:[%s5010_s20 + $0x58] sm:$0xff] %v2918_v62  ;;  %v3815_v27 = vadd.f32 %v3783_v29, %v4992_v25  ;;  %v2757_v2 = vpop.f32.mrb[13].mxu0 }
 0x1eb   : > { %v3652_v16 = vpop.f32.mrb[18].mxu1  ;;  %2948 = vst [vmem:[%s5010_s20 + $0x48] sm:$0xff] %v2916_v10  ;;  %v3816_v28 = vadd.f32 %v2757_v2, %v4994_v47  ;;  %v3784_v21 = vpop.f32.mrb[14].mxu0 }
 0x1ec   : > { %v1609_v54 = vpop.f32.mrb[19].mxu1  ;;  %v2889_v55 = vadd.f32 %v3815_v27, %v5003_v3  ;;  %v3817_v44 = vadd.f32 %v3784_v21, %v4996_v22  ;;  %v2760_v6 = vpop.f32.mrb[15].mxu0 }
 0x1ed   : > { %v2887_v26 = vadd.f32 %v3816_v28, %v5003_v3  ;;  %v3818_v32 = vadd.f32 %v2760_v6, %v4998_v4 }
 0x1ee   : > { %v2921_v25 = vmax.f32 %v2889_v55, 0.0  ;;  %v2890_v11 = vadd.f32 %v3817_v44, %v5003_v3 }
 0x1ef   : > { %v2919_v43 = vmax.f32 %v2887_v26, 0.0  ;;  %v2888_v58 = vadd.f32 %v3818_v32, %v5003_v3 }
 0x1f0   : > { %2953 = vst [vmem:[%s5010_s20 + $0x70] sm:$0xff] %v2921_v25  ;;  %v2922_v47 = vmax.f32 %v2890_v11, 0.0 }
 0x1f1   : > { %v3655_v42 = vpop.f32.mrb[20].mxu1  ;;  %2951 = vst [vmem:[%s5010_s20 + $0x60] sm:$0xff] %v2919_v43  ;;  %v2920_v48 = vmax.f32 %v2888_v58, 0.0  ;;  %v3787_v50 = vpop.f32.mrb[16].mxu0 }
 0x1f2   : > { %v1622_v5 = vpop.f32.mrb[21].mxu1  ;;  %2954 = vst [vmem:[%s5010_s20 + $0x78] sm:$0xff] %v2922_v47  ;;  %v3819_v22 = vadd.f32 %v3787_v50, %v3651_v20  ;;  %v2773_v39 = vpop.f32.mrb[17].mxu0 }
 0x1f3   : > { %v3656_v60 = vpop.f32.mrb[22].mxu1  ;;  %2952 = vst [vmem:[%s5010_s20 + $0x68] sm:$0xff] %v2920_v48  ;;  %v3820_v4 = vadd.f32 %v2773_v39, %v1606_v53  ;;  %v3788_v8 = vpop.f32.mrb[18].mxu0 }
 0x1f4   : > { %v1625_v37 = vpop.f32.mrb[23].mxu1  ;;  %v2893_v23 = vadd.f32 %v3819_v22, %v5003_v3  ;;  %v3821_v35 = vadd.f32 %v3788_v8, %v3652_v16  ;;  %v2776_v59 = vpop.f32.mrb[19].mxu0 }
 0x1f5   : > { %v2891_v30 = vadd.f32 %v3820_v4, %v5003_v3  ;;  %v3822_v63 = vadd.f32 %v2776_v59, %v1609_v54 }
 0x1f6   : > { %v2925_v31 = vmax.f32 %v2893_v23, 0.0  ;;  %v2894_v34 = vadd.f32 %v3821_v35, %v5003_v3 }
 0x1f7   : > { %v2923_v14 = vmax.f32 %v2891_v30, 0.0  ;;  %v2892_v1 = vadd.f32 %v3822_v63, %v5003_v3 }
 0x1f8   : > { %2957 = vst [vmem:[%s5010_s20 + $0x90] sm:$0xff] %v2925_v31  ;;  %v2926_v19 = vmax.f32 %v2894_v34, 0.0 }
 0x1f9   : > { %v3659_v13 = vpop.f32.mrb[24].mxu1  ;;  %2955 = vst [vmem:[%s5010_s20 + $0x80] sm:$0xff] %v2923_v14  ;;  %v2924_v12 = vmax.f32 %v2892_v1, 0.0  ;;  %v3791_v7 = vpop.f32.mrb[20].mxu0 }
 0x1fa   : > { %v1638_v18 = vpop.f32.mrb[25].mxu1  ;;  %2958 = vst [vmem:[%s5010_s20 + $0x98] sm:$0xff] %v2926_v19  ;;  %v3823_v0 = vadd.f32 %v3791_v7, %v3655_v42  ;;  %v2789_v41 = vpop.f32.mrb[21].mxu0 }
 0x1fb   : > { %v3660_v36 = vpop.f32.mrb[26].mxu1  ;;  %2956 = vst [vmem:[%s5010_s20 + $0x88] sm:$0xff] %v2924_v12  ;;  %v3824_v40 = vadd.f32 %v2789_v41, %v1622_v5  ;;  %v3792_v61 = vpop.f32.mrb[22].mxu0 }
 0x1fc   : > { %v1641_v45 = vpop.f32.mrb[27].mxu1  ;;  %v2897_v17 = vadd.f32 %v3823_v0, %v5003_v3  ;;  %v3825_v15 = vadd.f32 %v3792_v61, %v3656_v60  ;;  %v2792_v38 = vpop.f32.mrb[23].mxu0 }
 0x1fd   : > { %v2895_v49 = vadd.f32 %v3824_v40, %v5003_v3  ;;  %v3826_v9 = vadd.f32 %v2792_v38, %v1625_v37 }
 0x1fe   : > { %v2929_v51 = vmax.f32 %v2897_v17, 0.0  ;;  %v2898_v52 = vadd.f32 %v3825_v15, %v5003_v3 }
 0x1ff   : > { %v2927_v56 = vmax.f32 %v2895_v49, 0.0  ;;  %v2896_v57 = vadd.f32 %v3826_v9, %v5003_v3 }
 0x200   : > { %2961 = vst [vmem:[%s5010_s20 + $0xb0] sm:$0xff] %v2929_v51  ;;  %v2930_v46 = vmax.f32 %v2898_v52, 0.0 }
 0x201   : > { %v3663_v24 = vpop.f32.mrb[28].mxu1  ;;  %2959 = vst [vmem:[%s5010_s20 + $0xa0] sm:$0xff] %v2927_v56  ;;  %v2928_v33 = vmax.f32 %v2896_v57, 0.0  ;;  %v3795_v62 = vpop.f32.mrb[24].mxu0 }
 0x202   : > { %v1654_v20 = vpop.f32.mrb[29].mxu1  ;;  %2962 = vst [vmem:[%s5010_s20 + $0xb8] sm:$0xff] %v2930_v46  ;;  %v3827_v10 = vadd.f32 %v3795_v62, %v3659_v13  ;;  %v2805_v29 = vpop.f32.mrb[25].mxu0 }
 0x203   : > { %v3664_v53 = vpop.f32.mrb[30].mxu1  ;;  %2960 = vst [vmem:[%s5010_s20 + $0xa8] sm:$0xff] %v2928_v33  ;;  %v3828_v27 = vadd.f32 %v2805_v29, %v1638_v18  ;;  %v3796_v2 = vpop.f32.mrb[26].mxu0 }
 0x204   : > { %v1657_v16 = vpop.f32.mrb[31].mxu1  ;;  %v2901_v28 = vadd.f32 %v3827_v10, %v5003_v3  ;;  %v3829_v21 = vadd.f32 %v3796_v2, %v3660_v36  ;;  %v2808_v54 = vpop.f32.mrb[27].mxu0 }
 0x205   : > { %v2899_v55 = vadd.f32 %v3828_v27, %v5003_v3  ;;  %v3830_v44 = vadd.f32 %v2808_v54, %v1641_v45 }
 0x206   : > { %v2933_v6 = vmax.f32 %v2901_v28, 0.0  ;;  %v2902_v26 = vadd.f32 %v3829_v21, %v5003_v3 }
 0x207   : > { %v2931_v32 = vmax.f32 %v2899_v55, 0.0  ;;  %v2900_v25 = vadd.f32 %v3830_v44, %v5003_v3 }
 0x208   : > { %2965 = vst [vmem:[%s5010_s20 + $0xd0] sm:$0xff] %v2933_v6  ;;  %v2934_v11 = vmax.f32 %v2902_v26, 0.0 }
 0x209   : > { %2963 = vst [vmem:[%s5010_s20 + $0xc0] sm:$0xff] %v2931_v32  ;;  %v2932_v43 = vmax.f32 %v2900_v25, 0.0  ;;  %v3799_v58 = vpop.f32.mrb[28].mxu0 }
 0x20a   : > { %2966 = vst [vmem:[%s5010_s20 + $0xd8] sm:$0xff] %v2934_v11  ;;  %v3831_v47 = vadd.f32 %v3799_v58, %v3663_v24  ;;  %v2821_v42 = vpop.f32.mrb[29].mxu0 }
 0x20b   : > { %2964 = vst [vmem:[%s5010_s20 + $0xc8] sm:$0xff] %v2932_v43  ;;  %v3832_v48 = vadd.f32 %v2821_v42, %v1654_v20  ;;  %v3800_v50 = vpop.f32.mrb[30].mxu0 }
 0x20c   : > { %v2905_v5 = vadd.f32 %v3831_v47, %v5003_v3  ;;  %v3833_v22 = vadd.f32 %v3800_v50, %v3664_v53  ;;  %v2824_v39 = vpop.f32.mrb[31].mxu0 }
 0x20d   : > { %v2903_v60 = vadd.f32 %v3832_v48, %v5003_v3  ;;  %v3834_v4 = vadd.f32 %v2824_v39, %v1657_v16 }
 0x20e   : > { %v2937_v8 = vmax.f32 %v2905_v5, 0.0  ;;  %v2906_v37 = vadd.f32 %v3833_v22, %v5003_v3 }
 0x20f   : > { %v2935_v23 = vmax.f32 %v2903_v60, 0.0  ;;  %v2904_v35 = vadd.f32 %v3834_v4, %v5003_v3 }
 0x210   : > { %2969 = vst [vmem:[%s5010_s20 + $0xf0] sm:$0xff] %v2937_v8  ;;  %v2938_v59 = vmax.f32 %v2906_v37, 0.0 }
 0x211   : > { %2967 = vst [vmem:[%s5010_s20 + $0xe0] sm:$0xff] %v2935_v23  ;;  %v2936_v30 = vmax.f32 %v2904_v35, 0.0 }
 0x212   : > { %2970 = vst [vmem:[%s5010_s20 + $0xf8] sm:$0xff] %v2938_v59 }
 0x213   : > { %2968 = vst [vmem:[%s5010_s20 + $0xe8] sm:$0xff] %v2936_v30 }
 0x214 PF: > { %s13_s14 = sadd.s32 1, %s4136_s14   ;;  %s5141_s12 = smov %s4132_s13 }
 0x215   : > { %p10_p5 = scmp.ge.s32.totalorder %s13_s14, 4   ;;  %s5142_s13 = smov %s5144_s15 }
 0x217   :  { %12 = sbr.rel (!%p10_p5) target bundleno = 2 (0x2), region = 76 }

</bundles_post_ra>
